<compile_context>
chip_gen: v5e
topology: v5e:2x2
jax: 0.10.0
libtpu: 0.0.40
codegen_flags: <defaults>
</compile_context>

<pallas_src>
import jax
import jax.numpy as jnp
from jax.experimental import pallas as pl
from jax.experimental.pallas import tpu as pltpu


def _value_mlp_kernel(obs_ref, conf_ref,
                      w1t_ref, b1_ref,
                      w2t_ref, b2_ref,
                      w3t_ref, b3_ref,
                      w4t_ref, b4_ref,
                      o_ref):
    """Whole MLP hot path in one kernel, feature-major (batch in lanes).

    obs_ref:  [tile, obs_dim]     conf_ref: [tile, sup_dim]
    w1t_ref:  [256, obs_dim+sup_dim]   w2t_ref: [256, 256]
    w3t_ref:  [128, 256]               w4t_ref: [1, 128]       (all W^T, compute dtype)
    b*_ref:   [H, 1] f32 (broadcast along lanes)
    o_ref:    [1, 1, tile]  -- batch mapped to lanes (unmasked lane-dense store)
    """
    cd = w2t_ref.dtype  # MXU compute dtype (bf16 default; f32 = debug/exact mode)

    # Fuse torch.cat([obs, conf], dim=1) in VMEM (no HBM concat), then flip the
    # narrow (tile, 32) input to feature-major once. This is the only transpose
    # in the kernel (4x less XLU data than transposing the 128-wide hidden).
    x = jnp.concatenate([obs_ref[...], conf_ref[...]], axis=1)   # (tile, 32) f32
    xt = x.T.astype(cd)                                          # (32, tile)

    # Layer 1: single K=32 MXU pass.
    h = jnp.dot(w1t_ref[...], xt,
                preferred_element_type=jnp.float32) + b1_ref[...]   # (256, tile) f32
    h = jnp.maximum(h, 0.0).astype(cd)        # ReLU (Dropout = eval identity), bf16 staging

    # Layer 2
    h = jnp.dot(w2t_ref[...], h,
                preferred_element_type=jnp.float32) + b2_ref[...]   # (256, tile)
    h = jnp.maximum(h, 0.0).astype(cd)

    # Layer 3
    h = jnp.dot(w3t_ref[...], h,
                preferred_element_type=jnp.float32) + b3_ref[...]   # (128, tile)
    h = jnp.maximum(h, 0.0).astype(cd)

    # Layer 4 (128 -> 1): bf16 operands, f32 accumulate, natively lane-dense.
    v = jnp.dot(w4t_ref[...], h,
                preferred_element_type=jnp.float32) + b4_ref[...]   # (1, tile)
    o_ref[...] = v[None].astype(o_ref.dtype)                        # (1, 1, tile)


def _round_up(n, m):
    return -(-n // m) * m


def _num_tensorcores():
    """Best-effort TensorCores-per-chip (v7x has 2; v5e/v6e have 1)."""
    try:
        kind = (getattr(jax.devices()[0], "device_kind", "") or "").lower()
        if "v7" in kind or "7x" in kind:
            return 2
    except Exception:
        pass
    return 1


def _auto_batch_tile(batch, num_tensorcores, cap=512):
    """Batch tile (rows per grid step), always a multiple of 128 (lane-dense
    output store, bf16 tile minimums).

    Single-TC chips (v5e/v6e): one tile as large as possible (up to `cap`) --
    extra grid steps are pure overhead there. v7x (2 TCs): target an even
    number of 'parallel' grid steps so both cores get equal work.
    """
    rb = _round_up(batch, 128)
    if num_tensorcores <= 1 or rb <= 128:
        return min(cap, rb)
    # 2 TensorCores: split roughly in half, prefer an even step count.
    tile = min(cap, _round_up(-(-batch // 2), 128))
    if _round_up(batch, tile) // tile % 2 == 0:
        return tile
    for t in range(min(cap, rb), 127, -128):
        if _round_up(batch, t) // t % 2 == 0:
            return t
    return tile


def superposition_value_forward(obs, confidence_weights, params, *,
                                batch_tile=None, compute_dtype=jnp.bfloat16):
    """Runs the value network. obs: [B, obs_dim], confidence_weights: [B, sup_dim].

    Returns values of shape [B] (squeeze(-1) of the final Linear output).

    compute_dtype=jnp.bfloat16 (default) is the performance path: bf16 MXU
    matmuls with f32 accumulation and bf16 inter-layer staging (results differ
    from exact torch f32 eval at ~1e-3..1e-2 level). compute_dtype=jnp.float32
    is a correctness/debug mode only -- f32 matmuls are emulated via multiple
    bf16 MXU passes on v5e/v6e/v7x and are ~3x slower.
    """
    obs = jnp.asarray(obs, jnp.float32)
    conf = jnp.asarray(confidence_weights, jnp.float32)
    B, obs_dim = obs.shape
    sup_dim = conf.shape[1]

    (w1, b1), (w2, b2), (w3, b3), (w4, b4) = params

    # Pre-transpose weights once at trace time (feature-major kernel); biases
    # become (H, 1) columns broadcast along the lane (batch) axis.
    w1t = w1.T.astype(compute_dtype)                    # [256, obs_dim+sup_dim]
    w2t = w2.T.astype(compute_dtype)                    # [256, 256]
    w3t = w3.T.astype(compute_dtype)                    # [128, 256]
    w4t = w4.T.astype(compute_dtype)                    # [1, 128]
    b1f = b1.astype(jnp.float32).reshape(-1, 1)
    b2f = b2.astype(jnp.float32).reshape(-1, 1)
    b3f = b3.astype(jnp.float32).reshape(-1, 1)
    b4f = b4.astype(jnp.float32).reshape(1, 1)

    if batch_tile is None:
        batch_tile = _auto_batch_tile(B, _num_tensorcores())
    batch_tile = max(128, _round_up(int(batch_tile), 128))   # lane-dense tiles
    num_tiles = -(-B // batch_tile)
    padded_B = num_tiles * batch_tile
    if padded_B != B:                                   # ragged batch -> zero pad
        obs = jnp.pad(obs, ((0, padded_B - B), (0, 0)))
        conf = jnp.pad(conf, ((0, padded_B - B), (0, 0)))

    # Weights/biases fully resident in VMEM (<1 MiB); only the batch axis tiles.
    def full(a):
        return pl.BlockSpec(a.shape, lambda i, nd=a.ndim: (0,) * nd)

    out = pl.pallas_call(
        _value_mlp_kernel,
        out_shape=jax.ShapeDtypeStruct((num_tiles, 1, batch_tile), jnp.float32),
        grid_spec=pltpu.PrefetchScalarGridSpec(
            num_scalar_prefetch=0,
            grid=(num_tiles,),
            in_specs=[
                pl.BlockSpec((batch_tile, obs_dim), lambda i: (i, 0)),   # obs tile
                pl.BlockSpec((batch_tile, sup_dim), lambda i: (i, 0)),   # conf tile
                full(w1t), full(b1f),
                full(w2t), full(b2f),
                full(w3t), full(b3f),
                full(w4t), full(b4f),
            ],
            out_specs=pl.BlockSpec((1, 1, batch_tile), lambda i: (i, 0, 0)),
        ),
        compiler_params=pltpu.CompilerParams(
            dimension_semantics=("parallel",)),
    )(obs, conf, w1t, b1f, w2t, b2f, w3t, b3f, w4t, b4f)

    return out.reshape(-1)[:B]  # lane-dense rows -> [B]; squeeze(-1)


def init_params(key, obs_dim, superposition_dim, hidden_dims=(256, 256, 128)):
    """nn.Linear-style init U(-1/sqrt(fan_in), +1/sqrt(fan_in)).

    Weights stored as [in_features, out_features]; biases as [1, out_features].
    """
    dims = [obs_dim + superposition_dim] + list(hidden_dims) + [1]
    params = []
    for fan_in, fan_out in zip(dims[:-1], dims[1:]):
        key, kw, kb = jax.random.split(key, 3)
        bound = 1.0 / (fan_in ** 0.5)
        w = jax.random.uniform(kw, (fan_in, fan_out), jnp.float32, -bound, bound)
        b = jax.random.uniform(kb, (1, fan_out), jnp.float32, -bound, bound)
        params.append((w, b))
    return params


def reference_forward(obs, confidence_weights, params, compute_dtype=jnp.bfloat16):
    """Pure-JAX reference mirroring the kernel's mixed precision and cast points.

    With compute_dtype=jnp.float32 this is the f32 torch-eval forward.
    """
    obs = jnp.asarray(obs, jnp.float32)
    conf = jnp.asarray(confidence_weights, jnp.float32)
    (w1, b1), (w2, b2), (w3, b3), (w4, b4) = params
    cd = compute_dtype

    x = jnp.concatenate([obs, conf], axis=1)
    h = jnp.dot(x.astype(cd), w1.astype(cd), preferred_element_type=jnp.float32) + b1
    h = jnp.maximum(h, 0.0).astype(cd)
    h = jnp.dot(h, w2.astype(cd), preferred_element_type=jnp.float32) + b2
    h = jnp.maximum(h, 0.0).astype(cd)
    h = jnp.dot(h, w3.astype(cd), preferred_element_type=jnp.float32) + b3
    h = jnp.maximum(h, 0.0).astype(cd)
    v = jnp.dot(h, w4.astype(cd), preferred_element_type=jnp.float32) + b4
    return v[:, 0]


if __name__ == "__main__":
    key = jax.random.PRNGKey(0)
    obs_dim, sup_dim = 24, 8

    k_data, k_params = jax.random.split(key)
    params = init_params(k_params, obs_dim, sup_dim)

    # (batch, compute dtype, tolerance):
    #  - 256 / bf16: main perf configuration
    #  - 100 / bf16: ragged batch -> one 128-row tile (lane-dense store kept)
    #  -  64 / f32 : exact-f32 debug path
    cases = ((256, jnp.bfloat16, 1e-2),
             (100, jnp.bfloat16, 1e-2),
             (64, jnp.float32, 1e-3))

    for batch, cd, tol in cases:
        ko, kc = jax.random.split(jax.random.fold_in(k_data, batch))
        obs = jax.random.normal(ko, (batch, obs_dim), jnp.float32)
        conf = jax.nn.softmax(
            jax.random.normal(kc, (batch, sup_dim), jnp.float32), axis=-1)

        values = superposition_value_forward(obs, conf, params, compute_dtype=cd)
        values = jax.block_until_ready(values)

        ref = reference_forward(obs, conf, params, compute_dtype=cd)
        assert values.shape == (batch,), values.shape
        assert jnp.allclose(values, ref, atol=tol, rtol=tol), (values, ref)

    print("KERNEL_OK")
</pallas_src>

<mosaic_0001>
module attributes {stable_mosaic.version = 11 : i64} {
  func.func @_value_mlp_kernel(%arg0: i32, %arg1: memref<256x24xf32, #tpu.memory_space<vmem>>, %arg2: memref<256x8xf32, #tpu.memory_space<vmem>>, %arg3: memref<256x32xbf16, #tpu.memory_space<vmem>>, %arg4: memref<256x1xf32, #tpu.memory_space<vmem>>, %arg5: memref<256x256xbf16, #tpu.memory_space<vmem>>, %arg6: memref<256x1xf32, #tpu.memory_space<vmem>>, %arg7: memref<128x256xbf16, #tpu.memory_space<vmem>>, %arg8: memref<128x1xf32, #tpu.memory_space<vmem>>, %arg9: memref<1x128xbf16, #tpu.memory_space<vmem>>, %arg10: memref<1x1xf32, #tpu.memory_space<vmem>>, %arg11: memref<1x1x256xf32, #tpu.memory_space<vmem>>) attributes {dimension_semantics = [#tpu.dimension_semantics<parallel>], iteration_bounds = array<i64: 1>, scalar_prefetch = 0 : i64, scratch_operands = 0 : i64, tpu.core_type = #tpu.core_type<tc>, window_params = [{transform_indices = @transform_0, window_bounds = array<i64: 256, 24>}, {transform_indices = @transform_1, window_bounds = array<i64: 256, 8>}, {pipeline_mode = #tpu.pipeline_mode<synchronous>, transform_indices = @transform_2, window_bounds = array<i64: 256, 32>}, {pipeline_mode = #tpu.pipeline_mode<synchronous>, transform_indices = @transform_3, window_bounds = array<i64: 256, 1>}, {pipeline_mode = #tpu.pipeline_mode<synchronous>, transform_indices = @transform_4, window_bounds = array<i64: 256, 256>}, {pipeline_mode = #tpu.pipeline_mode<synchronous>, transform_indices = @transform_5, window_bounds = array<i64: 256, 1>}, {pipeline_mode = #tpu.pipeline_mode<synchronous>, transform_indices = @transform_6, window_bounds = array<i64: 128, 256>}, {pipeline_mode = #tpu.pipeline_mode<synchronous>, transform_indices = @transform_7, window_bounds = array<i64: 128, 1>}, {pipeline_mode = #tpu.pipeline_mode<synchronous>, transform_indices = @transform_8, window_bounds = array<i64: 1, 128>}, {pipeline_mode = #tpu.pipeline_mode<synchronous>, transform_indices = @transform_9, window_bounds = array<i64: 1, 1>}, {transform_indices = @transform_10, window_bounds = array<i64: 1, 1, 256>}]} {
    %c0 = arith.constant 0 : index
    %c0_0 = arith.constant 0 : index
    %0 = vector.load %arg1[%c0, %c0_0] : memref<256x24xf32, #tpu.memory_space<vmem>>, vector<256x24xf32>
    %c0_1 = arith.constant 0 : index
    %c0_2 = arith.constant 0 : index
    %1 = vector.load %arg2[%c0_1, %c0_2] : memref<256x8xf32, #tpu.memory_space<vmem>>, vector<256x8xf32>
    %2 = tpu.concatenate %0, %1 in 1 : vector<256x24xf32>, vector<256x8xf32> -> vector<256x32xf32>
    %3 = tpu.transpose %2, [1, 0] : vector<256x32xf32> -> vector<32x256xf32>
    %4 = arith.truncf %3 : vector<32x256xf32> to vector<32x256xbf16>
    %c0_3 = arith.constant 0 : index
    %c0_4 = arith.constant 0 : index
    %5 = vector.load %arg3[%c0_3, %c0_4] : memref<256x32xbf16, #tpu.memory_space<vmem>>, vector<256x32xbf16>
    %cst = arith.constant dense<0.000000e+00> : vector<256x256xf32>
    %6 = tpu.matmul %5, %4, %cst {dimension_numbers = #tpu.dot_dimension_numbers<[1], [0], [0], [1], [0, 0, 1, 1], [], []>} : vector<256x32xbf16>, vector<32x256xbf16>, vector<256x256xf32> -> vector<256x256xf32>
    %c0_5 = arith.constant 0 : index
    %c0_6 = arith.constant 0 : index
    %7 = vector.load %arg4[%c0_5, %c0_6] : memref<256x1xf32, #tpu.memory_space<vmem>>, vector<256x1xf32>
    %8 = vector.broadcast %7 : vector<256x1xf32> to vector<256x256xf32>
    %9 = arith.addf %6, %8 : vector<256x256xf32>
    %cst_7 = arith.constant 0.000000e+00 : f32
    %10 = vector.broadcast %cst_7 : f32 to vector<256x256xf32>
    %11 = arith.maximumf %9, %10 : vector<256x256xf32>
    %12 = arith.truncf %11 : vector<256x256xf32> to vector<256x256xbf16>
    %c0_8 = arith.constant 0 : index
    %c0_9 = arith.constant 0 : index
    %13 = vector.load %arg5[%c0_8, %c0_9] : memref<256x256xbf16, #tpu.memory_space<vmem>>, vector<256x256xbf16>
    %cst_10 = arith.constant dense<0.000000e+00> : vector<256x256xf32>
    %14 = tpu.matmul %13, %12, %cst_10 {dimension_numbers = #tpu.dot_dimension_numbers<[1], [0], [0], [1], [0, 0, 1, 1], [], []>} : vector<256x256xbf16>, vector<256x256xbf16>, vector<256x256xf32> -> vector<256x256xf32>
    %c0_11 = arith.constant 0 : index
    %c0_12 = arith.constant 0 : index
    %15 = vector.load %arg6[%c0_11, %c0_12] : memref<256x1xf32, #tpu.memory_space<vmem>>, vector<256x1xf32>
    %16 = vector.broadcast %15 : vector<256x1xf32> to vector<256x256xf32>
    %17 = arith.addf %14, %16 : vector<256x256xf32>
    %cst_13 = arith.constant 0.000000e+00 : f32
    %18 = vector.broadcast %cst_13 : f32 to vector<256x256xf32>
    %19 = arith.maximumf %17, %18 : vector<256x256xf32>
    %20 = arith.truncf %19 : vector<256x256xf32> to vector<256x256xbf16>
    %c0_14 = arith.constant 0 : index
    %c0_15 = arith.constant 0 : index
    %21 = vector.load %arg7[%c0_14, %c0_15] : memref<128x256xbf16, #tpu.memory_space<vmem>>, vector<128x256xbf16>
    %cst_16 = arith.constant dense<0.000000e+00> : vector<128x256xf32>
    %22 = tpu.matmul %21, %20, %cst_16 {dimension_numbers = #tpu.dot_dimension_numbers<[1], [0], [0], [1], [0, 0, 1, 1], [], []>} : vector<128x256xbf16>, vector<256x256xbf16>, vector<128x256xf32> -> vector<128x256xf32>
    %c0_17 = arith.constant 0 : index
    %c0_18 = arith.constant 0 : index
    %23 = vector.load %arg8[%c0_17, %c0_18] : memref<128x1xf32, #tpu.memory_space<vmem>>, vector<128x1xf32>
    %24 = vector.broadcast %23 : vector<128x1xf32> to vector<128x256xf32>
    %25 = arith.addf %22, %24 : vector<128x256xf32>
    %cst_19 = arith.constant 0.000000e+00 : f32
    %26 = vector.broadcast %cst_19 : f32 to vector<128x256xf32>
    %27 = arith.maximumf %25, %26 : vector<128x256xf32>
    %28 = arith.truncf %27 : vector<128x256xf32> to vector<128x256xbf16>
    %c0_20 = arith.constant 0 : index
    %c0_21 = arith.constant 0 : index
    %29 = vector.load %arg9[%c0_20, %c0_21] : memref<1x128xbf16, #tpu.memory_space<vmem>>, vector<1x128xbf16>
    %cst_22 = arith.constant dense<0.000000e+00> : vector<1x256xf32>
    %30 = tpu.matmul %29, %28, %cst_22 {dimension_numbers = #tpu.dot_dimension_numbers<[1], [0], [0], [1], [0, 0, 1, 1], [], []>} : vector<1x128xbf16>, vector<128x256xbf16>, vector<1x256xf32> -> vector<1x256xf32>
    %c0_23 = arith.constant 0 : index
    %c0_24 = arith.constant 0 : index
    %31 = vector.load %arg10[%c0_23, %c0_24] : memref<1x1xf32, #tpu.memory_space<vmem>>, vector<1x1xf32>
    %32 = vector.broadcast %31 : vector<1x1xf32> to vector<1x256xf32>
    %33 = arith.addf %30, %32 : vector<1x256xf32>
    %34 = vector.shape_cast %33 : vector<1x256xf32> to vector<1x1x256xf32>
    %c0_25 = arith.constant 0 : index
    %c0_26 = arith.constant 0 : index
    %c0_27 = arith.constant 0 : index
    %35 = vector.load %arg11[%c0_25, %c0_26, %c0_27] : memref<1x1x256xf32, #tpu.memory_space<vmem>>, vector<1x1x256xf32>
    tpu.vector_store %arg11[%c0_25, %c0_26, %c0_27], %34 {strides = array<i32>} : memref<1x1x256xf32, #tpu.memory_space<vmem>>, vector<1x1x256xf32>,
    return
  }
  func.func @transform_0(%arg0: i32) -> (i32, i32) {
    %c0_i32 = arith.constant 0 : i32
    %c0_i32_0 = arith.constant 0 : i32
    return %arg0, %c0_i32 : i32, i32
  }
  func.func @transform_1(%arg0: i32) -> (i32, i32) {
    %c0_i32 = arith.constant 0 : i32
    %c0_i32_0 = arith.constant 0 : i32
    return %arg0, %c0_i32 : i32, i32
  }
  func.func @transform_2(%arg0: i32) -> (i32, i32) {
    %c0_i32 = arith.constant 0 : i32
    %c0_i32_0 = arith.constant 0 : i32
    %c0_i32_1 = arith.constant 0 : i32
    return %c0_i32, %c0_i32_0 : i32, i32
  }
  func.func @transform_3(%arg0: i32) -> (i32, i32) {
    %c0_i32 = arith.constant 0 : i32
    %c0_i32_0 = arith.constant 0 : i32
    %c0_i32_1 = arith.constant 0 : i32
    return %c0_i32, %c0_i32_0 : i32, i32
  }
  func.func @transform_4(%arg0: i32) -> (i32, i32) {
    %c0_i32 = arith.constant 0 : i32
    %c0_i32_0 = arith.constant 0 : i32
    %c0_i32_1 = arith.constant 0 : i32
    return %c0_i32, %c0_i32_0 : i32, i32
  }
  func.func @transform_5(%arg0: i32) -> (i32, i32) {
    %c0_i32 = arith.constant 0 : i32
    %c0_i32_0 = arith.constant 0 : i32
    %c0_i32_1 = arith.constant 0 : i32
    return %c0_i32, %c0_i32_0 : i32, i32
  }
  func.func @transform_6(%arg0: i32) -> (i32, i32) {
    %c0_i32 = arith.constant 0 : i32
    %c0_i32_0 = arith.constant 0 : i32
    %c0_i32_1 = arith.constant 0 : i32
    return %c0_i32, %c0_i32_0 : i32, i32
  }
  func.func @transform_7(%arg0: i32) -> (i32, i32) {
    %c0_i32 = arith.constant 0 : i32
    %c0_i32_0 = arith.constant 0 : i32
    %c0_i32_1 = arith.constant 0 : i32
    return %c0_i32, %c0_i32_0 : i32, i32
  }
  func.func @transform_8(%arg0: i32) -> (i32, i32) {
    %c0_i32 = arith.constant 0 : i32
    %c0_i32_0 = arith.constant 0 : i32
    %c0_i32_1 = arith.constant 0 : i32
    return %c0_i32, %c0_i32_0 : i32, i32
  }
  func.func @transform_9(%arg0: i32) -> (i32, i32) {
    %c0_i32 = arith.constant 0 : i32
    %c0_i32_0 = arith.constant 0 : i32
    %c0_i32_1 = arith.constant 0 : i32
    return %c0_i32, %c0_i32_0 : i32, i32
  }
  func.func @transform_10(%arg0: i32) -> (i32, i32, i32) {
    %c0_i32 = arith.constant 0 : i32
    %c0_i32_0 = arith.constant 0 : i32
    %c0_i32_1 = arith.constant 0 : i32
    return %arg0, %c0_i32, %c0_i32_0 : i32, i32, i32
  }
}

</mosaic_0001>

<bundles_post_ra>
// kernel: tpu_custom_call.1
= control target key start
LH: loop header
LB: loop body
LE: loop exit
PB: predicated region body
PF: predicated region fallthrough
CT: control target
= control target key end

     0   :  { %s4408_s0 = inlined_call_operand.vmem [shape: f32[256,24], index: 0, kind: input, shape index: {}]   ;;  %s4409_s1 = inlined_call_operand.vmem [shape: f32[256,8], index: 1, kind: input, shape index: {}]   ;;  %s4410_s2 = inlined_call_operand.vmem [shape: bf16[256,32], index: 2, kind: input, shape index: {}]   ;;  %s4411_s3 = inlined_call_operand.vmem [shape: f32[256,1], index: 3, kind: input, shape index: {}]   ;;  %s4412_s4 = inlined_call_operand.vmem [shape: bf16[256,256], index: 4, kind: input, shape index: {}]   ;;  %s4413_s5 = inlined_call_operand.vmem [shape: f32[256,1], index: 5, kind: input, shape index: {}]   ;;  %s4414_s6 = inlined_call_operand.vmem [shape: bf16[128,256], index: 6, kind: input, shape index: {}]   ;;  %s4415_s7 = inlined_call_operand.vmem [shape: f32[128,1], index: 7, kind: input, shape index: {}]   ;;  %s4416_s8 = inlined_call_operand.vmem [shape: bf16[1,128], index: 8, kind: input, shape index: {}]   ;;  %s4417_s9 = inlined_call_operand.<no memory space> [shape: f32[1,1], index: 9, kind: input, shape index: {}]   ;;  %s4418_s10 = inlined_call_operand.hbm [shape: f32[1,1,256], index: 10, kind: output, shape index: {}]  }
   0x1   :  { %v15_v0 = vstv %s4417_s9 }
   0x2   :  { %16 = vst [vmem:[#allocation2] sm:$0x1] %v15_v0 }
   0x3   :  { %v75_v1 = vld [vmem:[%s4409_s1 + $0x20] sm:$0xff]  ;;  %v76_v2 = vld [vmem:[%s4409_s1 + $0x28] sm:$0xff]  ;;  %s2756_s9 = smov 24   ;;  %v77_v7 = vld [vmem:[%s4409_s1 + $0x30] sm:$0xff] }
   0x4   :  { %v71_v3 = vld [vmem:[%s4409_s1] sm:$0xff]  ;;  %v2657_v4 = vpack.i.bf16 %v76_v2, %v75_v1  ;;  %v72_v5 = vld [vmem:[%s4409_s1 + $0x8] sm:$0xff]  ;;  %v78_v8 = vld [vmem:[%s4409_s1 + $0x38] sm:$0xff] }
   0x5   :  { %v2647_v6 = vpack.i.bf16 %v72_v5, %v71_v3  ;;  %v73_v9 = vld [vmem:[%s4409_s1 + $0x10] sm:$0xff]  ;;  %v74_v10 = vld [vmem:[%s4409_s1 + $0x18] sm:$0xff] }
   0x6   :  { %2658 = vrot.lane.b32.xlu1 %v2657_v4, %s2756_s9 }
   0x7   :  { %2648 = vrot.lane.b32.xlu0 %v2647_v6, %s2756_s9 }
   0x8   :  { %17 = vsyncpa [#allocation4], 0  ;;  %v2662_v11 = vpack.i.bf16 %v78_v8, %v77_v7  ;;  %v2652_v12 = vpack.i.bf16 %v74_v10, %v73_v9  ;;  %v85_v13 = vld [vmem:[%s4409_s1 + $0x70] sm:$0xff]  ;;  %v86_v14 = vld [vmem:[%s4409_s1 + $0x78] sm:$0xff]  ;;  %v2757_v21 = vmov 0   ;;  %vm231_vm0 = vcmask 195584  }
   0x9   :  { %v83_v15 = vld [vmem:[%s4409_s1 + $0x60] sm:$0xff]  ;;  %v84_v16 = vld [vmem:[%s4409_s1 + $0x68] sm:$0xff]  ;;  %v2682_v17 = vpack.i.bf16 %v86_v14, %v85_v13  ;;  %v89_v19 = vld [vmem:[%s4409_s1 + $0x90] sm:$0xff]  ;;  %2727 = vset.pattern.permute.xlu1 %v2757_v21  ;;  %vm636_vm1 = vcmask 261120   ;;  %s2283_s24 = sshll.u32 %s4418_s10, 4  ;;  %vm2268_vm2 = vcmask 1040384   ;;  %s2284_s24 = int_to_ptr.hbm [resolvable:$true] %s2283_s24 }
   0xa   :  { %v2677_v18 = vpack.i.bf16 %v84_v16, %v83_v15  ;;  %v90_v20 = vld [vmem:[%s4409_s1 + $0x98] sm:$0xff]  ;;  %v87_v22 = vld [vmem:[%s4409_s1 + $0x80] sm:$0xff]  ;;  %v88_v23 = vld [vmem:[%s4409_s1 + $0x88] sm:$0xff] }
   0xb   :  { %v2692_v24 = vpack.i.bf16 %v90_v20, %v89_v19  ;;  %v2687_v25 = vpack.i.bf16 %v88_v23, %v87_v22  ;;  %v93_v26 = vld [vmem:[%s4409_s1 + $0xb0] sm:$0xff]  ;;  %v94_v27 = vld [vmem:[%s4409_s1 + $0xb8] sm:$0xff]  ;;  %v91_v28 = vld [vmem:[%s4409_s1 + $0xa0] sm:$0xff] }
   0xc   :  { %v92_v29 = vld [vmem:[%s4409_s1 + $0xa8] sm:$0xff]  ;;  %v2702_v30 = vpack.i.bf16 %v94_v27, %v93_v26  ;;  %v79_v32 = vld [vmem:[%s4409_s1 + $0x40] sm:$0xff]  ;;  %v97_v34 = vld [vmem:[%s4409_s1 + $0xd0] sm:$0xff] }
   0xd   :  { %v2697_v31 = vpack.i.bf16 %v92_v29, %v91_v28  ;;  %v80_v33 = vld [vmem:[%s4409_s1 + $0x48] sm:$0xff]  ;;  %v98_v35 = vld [vmem:[%s4409_s1 + $0xd8] sm:$0xff]  ;;  %v81_v38 = vld [vmem:[%s4409_s1 + $0x50] sm:$0xff] }
   0xe   :  { %2663 = vrot.lane.b32.xlu1 %v2662_v11, %s2756_s9  ;;  %v2667_v36 = vpack.i.bf16 %v80_v33, %v79_v32  ;;  %v2712_v37 = vpack.i.bf16 %v98_v35, %v97_v34  ;;  %v82_v39 = vld [vmem:[%s4409_s1 + $0x58] sm:$0xff]  ;;  %v101_v40 = vld [vmem:[%s4409_s1 + $0xf0] sm:$0xff]  ;;  %v95_v45 = vld [vmem:[%s4409_s1 + $0xc0] sm:$0xff] }
   0xf   :  { %2653 = vrot.lane.b32.xlu0 %v2652_v12, %s2756_s9  ;;  %v102_v41 = vld [vmem:[%s4409_s1 + $0xf8] sm:$0xff]  ;;  %v2672_v42 = vpack.i.bf16 %v82_v39, %v81_v38  ;;  %v378_v44 = vld [vmem:[%s4411_s3 + $0x70] sm:$0xff]  ;;  %v96_v46 = vld [vmem:[%s4409_s1 + $0xc8] sm:$0xff] }
  0x10   :  { %2668 = vrot.lane.b32.xlu2 %v2667_v36, %s2756_s9  ;;  %v2722_v43 = vpack.i.bf16 %v102_v41, %v101_v40  ;;  %v2707_v47 = vpack.i.bf16 %v96_v46, %v95_v45  ;;  %v379_v48 = vld [vmem:[%s4411_s3 + $0x78] sm:$0xff]  ;;  %v394_v49 = vld [vmem:[%s4411_s3 + $0xf0] sm:$0xff]  ;;  %v99_v50 = vld [vmem:[%s4409_s1 + $0xe0] sm:$0xff] }
  0x11   :  { %v100_v51 = vld [vmem:[%s4409_s1 + $0xe8] sm:$0xff]  ;;  %v395_v53 = vld [vmem:[%s4411_s3 + $0xf8] sm:$0xff]  ;;  %v376_v54 = vld [vmem:[%s4411_s3 + $0x60] sm:$0xff] }
  0x12   :  { %v2717_v52 = vpack.i.bf16 %v100_v51, %v99_v50  ;;  %v377_v55 = vld [vmem:[%s4411_s3 + $0x68] sm:$0xff]  ;;  %v392_v56 = vld [vmem:[%s4411_s3 + $0xe0] sm:$0xff]  ;;  %v374_v62 = vld [vmem:[%s4411_s3 + $0x50] sm:$0xff] }
  0x13   :  { %v393_v57 = vld [vmem:[%s4411_s3 + $0xe8] sm:$0xff]  ;;  %v39_v60 = vld [vmem:[%s4408_s0] sm:$0xff]  ;;  %v375_v4 = vld [vmem:[%s4411_s3 + $0x58] sm:$0xff] }
  0x14   :  { %v40_v3 = vld [vmem:[%s4408_s0 + $0x8] sm:$0xff]  ;;  %v41_v7 = vld [vmem:[%s4408_s0 + $0x10] sm:$0xff]  ;;  %v55_v15 = vld [vmem:[%s4408_s0 + $0x80] sm:$0xff] }
  0x15   :  { %v390_v11 = vld [vmem:[%s4411_s3 + $0xd0] sm:$0xff]  ;;  %v42_v16 = vld [vmem:[%s4408_s0 + $0x18] sm:$0xff]  ;;  %v372_v29 = vld [vmem:[%s4411_s3 + $0x40] sm:$0xff] }
  0x16   :  { %2683 = vrot.lane.b32.xlu1 %v2682_v17, %s2756_s9  ;;  %v44_v34 = vld [vmem:[%s4408_s0 + $0x28] sm:$0xff]  ;;  %v58_v40 = vld [vmem:[%s4408_s0 + $0x98] sm:$0xff]  ;;  %v45_v41 = vld [vmem:[%s4408_s0 + $0x30] sm:$0xff] }
  0x17   :  { %2678 = vrot.lane.b32.xlu0 %v2677_v18, %s2756_s9  ;;  %v391_v18 = vld [vmem:[%s4411_s3 + $0xd8] sm:$0xff]  ;;  %v373_v36 = vld [vmem:[%s4411_s3 + $0x48] sm:$0xff]  ;;  %v388_v45 = vld [vmem:[%s4411_s3 + $0xc0] sm:$0xff] }
  0x18   :  { %2673 = vrot.lane.b32.xlu2 %v2672_v42, %s2756_s9  ;;  %v46_v51 = vld [vmem:[%s4408_s0 + $0x38] sm:$0xff] }
  0x1e   :  { %2693 = vrot.lane.b32.xlu1 %v2692_v24, %s2756_s9  ;;  %v56_v24 = vld [vmem:[%s4408_s0 + $0x88] sm:$0xff] }
  0x1f   :  { %2688 = vrot.lane.b32.xlu0 %v2687_v25, %s2756_s9  ;;  %v43_v25 = vld [vmem:[%s4408_s0 + $0x20] sm:$0xff] }
  0x26   :  { %2703 = vrot.lane.b32.xlu1 %v2702_v30, %s2756_s9 }
  0x27   :  { %2698 = vrot.lane.b32.xlu0 %v2697_v31, %s2756_s9  ;;  %v57_v31 = vld [vmem:[%s4408_s0 + $0x90] sm:$0xff] }
  0x2e   :  { %2713 = vrot.lane.b32.xlu1 %v2712_v37, %s2756_s9 }
  0x2f   :  { %2708 = vrot.lane.b32.xlu0 %v2707_v47, %s2756_s9 }
  0x36   :  { %2723 = vrot.lane.b32.xlu1 %v2722_v43, %s2756_s9 }
  0x37   :  { %2718 = vrot.lane.b32.xlu0 %v2717_v52, %s2756_s9 }
  0x3e   :  { %468 = vperm.xlu1 %2727, %v378_v44  }
  0x46   :  { %473 = vperm.xlu1 %2727, %v379_v48   ;;  %v59_v48 = vld [vmem:[%s4408_s0 + $0xa0] sm:$0xff] }
  0x4e   :  { %548 = vperm.xlu1 %2727, %v394_v49  }
  0x56   :  { %553 = vperm.xlu1 %2727, %v395_v53   ;;  %v370_v53 = vld [vmem:[%s4411_s3 + $0x30] sm:$0xff] }
  0x5e   :  { %458 = vperm.xlu1 %2727, %v376_v54  }
  0x66   :  { %463 = vperm.xlu1 %2727, %v377_v55  }
  0x6a   :  { %v2669_v55 = vpop.permute.xlu2 %2668 }
  0x6e   :  { %538 = vperm.xlu1 %2727, %v392_v56  }
  0x76   :  { %543 = vperm.xlu1 %2727, %v393_v57   ;;  %v60_v57 = vld [vmem:[%s4408_s0 + $0xa8] sm:$0xff] }
  0x78   :  { %v2659_v58 = vpop.permute.xlu1 %2658 }
  0x79   :  { %v2649_v59 = vpop.permute.xlu0 %2648  ;;  %v2660_v22 = vunpack.i.l.bf16 %v2659_v58  ;;  %v2661_v32 = vunpack.i.h.bf16 %v2659_v58  ;;  %v2670_v58 = vunpack.i.l.bf16 %v2669_v55 }
  0x7a   :  { %v2650_v61 = vunpack.i.l.bf16 %v2649_v59  ;;  %v2651_v0 = vunpack.i.h.bf16 %v2649_v59 }
  0x7b   :  { %v236_v28 = vsel %vm231_vm0, %v43_v25, %v2660_v22  ;;  %v237_v37 = vsel %vm231_vm0, %v44_v34, %v2661_v32  ;;  %v63_v22 = vld [vmem:[%s4408_s0 + $0xc0] sm:$0xff] }
  0x7c   :  { %v232_v63 = vsel %vm231_vm0, %v39_v60, %v2650_v61  ;;  %v233_v5 = vsel %vm231_vm0, %v40_v3, %v2651_v0  ;;  %v47_v60 = vld [vmem:[%s4408_s0 + $0x40] sm:$0xff]  ;;  %v48_v3 = vld [vmem:[%s4408_s0 + $0x48] sm:$0xff] }
  0x7d   :  { %264 = vxpose.xlu2.b32.start [1/16] (narrow) %v232_v63, 32  ;;  %v240_v63 = vsel %vm231_vm0, %v47_v60, %v2670_v58  ;;  %v51_v32 = vld [vmem:[%s4408_s0 + $0x60] sm:$0xff]  ;;  %v367_v60 = vld [vmem:[%s4411_s3 + $0x18] sm:$0xff] }
  0x7e   :  { %448 = vperm.xlu1 %2727, %v374_v62   ;;  %v371_v62 = vld [vmem:[%s4411_s3 + $0x38] sm:$0xff] }
  0x80   :  { %v2961_v1 = vpop.permute.xlu1 %2663 }
  0x81   :  { %v2654_v2 = vpop.permute.xlu0 %2653  ;;  %v2665_v38 = vunpack.i.l.bf16 %v2961_v1  ;;  %v2666_v49 = vunpack.i.h.bf16 %v2961_v1  ;;  %v61_v1 = vld [vmem:[%s4408_s0 + $0xb0] sm:$0xff] }
  0x82   :  { %v2655_v6 = vunpack.i.l.bf16 %v2654_v2  ;;  %v2656_v12 = vunpack.i.h.bf16 %v2654_v2  ;;  %v2671_v2 = vunpack.i.h.bf16 %v2669_v55  ;;  %v67_v55 = vld [vmem:[%s4408_s0 + $0xe0] sm:$0xff] }
  0x83   :  { %v238_v44 = vsel %vm231_vm0, %v45_v41, %v2665_v38  ;;  %v239_v54 = vsel %vm231_vm0, %v46_v51, %v2666_v49  ;;  %v65_v38 = vld [vmem:[%s4408_s0 + $0xd0] sm:$0xff]  ;;  %v52_v41 = vld [vmem:[%s4408_s0 + $0x68] sm:$0xff] }
  0x84   :  { %v234_v10 = vsel %vm231_vm0, %v41_v7, %v2655_v6  ;;  %v235_v20 = vsel %vm231_vm0, %v42_v16, %v2656_v12  ;;  %v386_v6 = vld [vmem:[%s4411_s3 + $0xb0] sm:$0xff]  ;;  %v241_v7 = vsel %vm231_vm0, %v48_v3, %v2671_v2  ;;  %v62_v12 = vld [vmem:[%s4408_s0 + $0xb8] sm:$0xff] }
  0x85   :  { %265 = vxpose.xlu2.b32.cont [2/16] (narrow) %v233_v5, 32  ;;  %v387_v16 = vld [vmem:[%s4411_s3 + $0xb8] sm:$0xff] }
  0x86   :  { %453 = vperm.xlu1 %2727, %v375_v4  }
  0x88   :  { %v2973_v8 = vpop.permute.xlu1 %2683 }
  0x89   :  { %v2975_v9 = vpop.permute.xlu0 %2678 }
  0x8d   :  { %266 = vxpose.xlu2.b32.cont [3/16] (narrow) %v234_v10, 32  ;;  %v2674_v10 = vpop.permute.xlu2 %2673 }
  0x8e   :  { %528 = vperm.xlu1 %2727, %v390_v11  }
  0x90   :  { %v2694_v13 = vpop.permute.xlu1 %2693 }
  0x91   :  { %v2689_v14 = vpop.permute.xlu0 %2688  ;;  %v2695_v30 = vunpack.i.l.bf16 %v2694_v13  ;;  %v2696_v39 = vunpack.i.h.bf16 %v2694_v13  ;;  %v2675_v13 = vunpack.i.l.bf16 %v2674_v10 }
  0x92   :  { %v2690_v17 = vunpack.i.l.bf16 %v2689_v14  ;;  %v2691_v23 = vunpack.i.h.bf16 %v2689_v14  ;;  %v49_v14 = vld [vmem:[%s4408_s0 + $0x50] sm:$0xff] }
  0x93   :  { %v250_v35 = vsel %vm231_vm0, %v57_v31, %v2695_v30  ;;  %v251_v43 = vsel %vm231_vm0, %v58_v40, %v2696_v39  ;;  %v64_v31 = vld [vmem:[%s4408_s0 + $0xc8] sm:$0xff]  ;;  %v2681_v39 = vunpack.i.h.bf16 %v2975_v9 }
  0x94   :  { %v248_v19 = vsel %vm231_vm0, %v55_v15, %v2690_v17  ;;  %v249_v27 = vsel %vm231_vm0, %v56_v24, %v2691_v23  ;;  %v2676_v23 = vunpack.i.h.bf16 %v2674_v10  ;;  %v50_v24 = vld [vmem:[%s4408_s0 + $0x58] sm:$0xff] }
  0x95   :  { %296 = vxpose.xlu0.b32.start [1/16] (narrow) %v248_v19, 32  ;;  %267 = vxpose.xlu2.b32.cont [4/16] (narrow) %v235_v20, 32 }
  0x96   :  { %533 = vperm.xlu1 %2727, %v391_v18   ;;  %v242_v18 = vsel %vm231_vm0, %v49_v14, %v2675_v13  ;;  %v364_v14 = vld [vmem:[%s4411_s3] sm:$0xff] }
  0x98   :  { %v2998_v26 = vpop.permute.xlu1 %2703 }
  0x99   :  { %v2699_v46 = vpop.permute.xlu0 %2698  ;;  %v2705_v0 = vunpack.i.l.bf16 %v2998_v26  ;;  %v2706_v11 = vunpack.i.h.bf16 %v2998_v26  ;;  %v368_v26 = vld [vmem:[%s4411_s3 + $0x20] sm:$0xff] }
  0x9a   :  { %v2700_v47 = vunpack.i.l.bf16 %v2699_v46  ;;  %v2701_v56 = vunpack.i.h.bf16 %v2699_v46  ;;  %v2685_v46 = vunpack.i.l.bf16 %v2973_v8 }
  0x9b   :  { %v254_v4 = vsel %vm231_vm0, %v61_v1, %v2705_v0  ;;  %v255_v15 = vsel %vm231_vm0, %v62_v12, %v2706_v11  ;;  %v382_v1 = vld [vmem:[%s4411_s3 + $0x90] sm:$0xff]  ;;  %v70_v11 = vld [vmem:[%s4408_s0 + $0xf8] sm:$0xff] }
  0x9c   :  { %v252_v52 = vsel %vm231_vm0, %v59_v48, %v2700_v47  ;;  %v253_v61 = vsel %vm231_vm0, %v60_v57, %v2701_v56  ;;  %v66_v47 = vld [vmem:[%s4408_s0 + $0xd8] sm:$0xff]  ;;  %v53_v48 = vld [vmem:[%s4408_s0 + $0x70] sm:$0xff]  ;;  %v2686_v56 = vunpack.i.h.bf16 %v2973_v8  ;;  %v68_v8 = vld [vmem:[%s4408_s0 + $0xe8] sm:$0xff] }
  0x9d   :  { %297 = vxpose.xlu0.b32.cont [2/16] (narrow) %v249_v27, 32  ;;  %268 = vxpose.xlu2.b32.cont [5/16] (narrow) %v236_v28, 32  ;;  %v243_v27 = vsel %vm231_vm0, %v50_v24, %v2676_v23  ;;  %v2680_v28 = vunpack.i.l.bf16 %v2975_v9  ;;  %v246_v51 = vsel %vm231_vm0, %v53_v48, %v2685_v46  ;;  %v54_v57 = vld [vmem:[%s4408_s0 + $0x78] sm:$0xff] }
  0x9e   :  { %438 = vperm.xlu1 %2727, %v372_v29  }
  0xa0   :  { %v3008_v33 = vpop.permute.xlu1 %2713 }
  0xa1   :  { %v2709_v17 = vpop.permute.xlu0 %2708  ;;  %v2716_v9 = vunpack.i.h.bf16 %v3008_v33 }
  0xa2   :  { %v2710_v20 = vunpack.i.l.bf16 %v2709_v17  ;;  %v2711_v29 = vunpack.i.h.bf16 %v2709_v17  ;;  %v381_v17 = vld [vmem:[%s4411_s3 + $0x88] sm:$0xff] }
  0xa3   :  { %v259_v49 = vsel %vm231_vm0, %v66_v47, %v2716_v9  ;;  %v997_v47 = vld [vmem:[%s4413_s5 + $0x30] sm:$0xff] }
  0xa4   :  { %v256_v25 = vsel %vm231_vm0, %v63_v22, %v2710_v20  ;;  %v257_v34 = vsel %vm231_vm0, %v64_v31, %v2711_v29  ;;  %v1006_v22 = vld [vmem:[%s4413_s5 + $0x78] sm:$0xff]  ;;  %v1004_v31 = vld [vmem:[%s4413_s5 + $0x68] sm:$0xff] }
  0xa5   :  { %298 = vxpose.xlu0.b32.cont [3/16] (narrow) %v250_v35, 32  ;;  %269 = vxpose.xlu2.b32.cont [6/16] (narrow) %v237_v37, 32  ;;  %v244_v35 = vsel %vm231_vm0, %v51_v32, %v2680_v28  ;;  %v2715_v37 = vunpack.i.l.bf16 %v3008_v33  ;;  %v2580_v32 = vld [vmem:[%s4410_s2] sm:$0xff] }
  0xa6   :  { %443 = vperm.xlu1 %2727, %v373_v36   ;;  %v384_v36 = vld [vmem:[%s4411_s3 + $0xa0] sm:$0xff] }
  0xa8   :  { %v3025_v42 = vpop.permute.xlu1 %2723 }
  0xa9   :  { %v2719_v33 = vpop.permute.xlu0 %2718  ;;  %v2725_v2 = vunpack.i.l.bf16 %v3025_v42  ;;  %v2726_v10 = vunpack.i.h.bf16 %v3025_v42  ;;  %v365_v42 = vld [vmem:[%s4411_s3 + $0x8] sm:$0xff] }
  0xab   :  { %v263_v13 = vsel %vm231_vm0, %v70_v11, %v2726_v10  ;;  %v1816_v11 = vld [vmem:[%s4415_s7 + $0x28] sm:$0xff] }
  0xad   :  { %299 = vxpose.xlu0.b32.cont [4/16] (narrow) %v251_v43, 32  ;;  %270 = vxpose.xlu2.b32.cont [7/16] (narrow) %v238_v44, 32  ;;  %v258_v43 = vsel %vm231_vm0, %v65_v38, %v2715_v37  ;;  %v385_v44 = vld [vmem:[%s4411_s3 + $0xa8] sm:$0xff]  ;;  %v1017_v38 = vld [vmem:[%s4413_s5 + $0xd0] sm:$0xff] }
  0xae   :  { %518 = vperm.xlu1 %2727, %v388_v45   ;;  %v245_v45 = vsel %vm231_vm0, %v52_v41, %v2681_v39  ;;  %v2581_v39 = vld [vmem:[%s4410_s2 + $0x8] sm:$0xff] }
  0xb0   :  { %v3036_v50 = vpop.permute.xlu1 %468 }
  0xb5   :  { %300 = vxpose.xlu0.b32.cont [5/16] (narrow) %v252_v52, 32  ;;  %271 = vxpose.xlu2.b32.cont [8/16] (narrow) %v239_v54, 32  ;;  %v2720_v54 = vunpack.i.l.bf16 %v2719_v33 }
  0xb6   :  { %428 = vperm.xlu1 %2727, %v370_v53   ;;  %v366_v53 = vld [vmem:[%s4411_s3 + $0x10] sm:$0xff] }
  0xb7   :  { %v260_v58 = vsel %vm231_vm0, %v67_v55, %v2720_v54  ;;  %v1011_v54 = vld [vmem:[%s4413_s5 + $0xa0] sm:$0xff]  ;;  %v2583_v55 = vld [vmem:[%s4410_s2 + $0x18] sm:$0xff] }
  0xb8   :  { %v3049_v59 = vpop.permute.xlu1 %473 }
  0xbd   :  { %301 = vxpose.xlu0.b32.cont [6/16] (narrow) %v253_v61, 32  ;;  %272 = vxpose.xlu2.b32.cont [9/16] (narrow) %v240_v63, 32  ;;  %v247_v61 = vsel %vm231_vm0, %v54_v57, %v2686_v56  ;;  %v2721_v63 = vunpack.i.h.bf16 %v2719_v33  ;;  %v994_v56 = vld [vmem:[%s4413_s5 + $0x18] sm:$0xff] }
  0xbe   :  { %433 = vperm.xlu1 %2727, %v371_v62  }
  0xbf   :  { %v261_v0 = vsel %vm231_vm0, %v68_v8, %v2721_v63  ;;  %v369_v63 = vld [vmem:[%s4411_s3 + $0x28] sm:$0xff] }
  0xc0   :  { %v3067_v5 = vpop.permute.xlu1 %548  ;;  %v1008_v8 = vld [vmem:[%s4413_s5 + $0x88] sm:$0xff] }
  0xc5   :  { %302 = vxpose.xlu0.b32.cont [7/16] (narrow) %v254_v4, 32  ;;  %273 = vxpose.xlu2.b32.cont [10/16] (narrow) %v241_v7, 32  ;;  %v69_v4 = vld [vmem:[%s4408_s0 + $0xf0] sm:$0xff]  ;;  %v383_v7 = vld [vmem:[%s4411_s3 + $0x98] sm:$0xff] }
  0xc6   :  { %508 = vperm.xlu1 %2727, %v386_v6   ;;  %v262_v6 = vsel %vm231_vm0, %v69_v4, %v2725_v2  ;;  %v1822_v4 = vld [vmem:[%s4415_s7 + $0x58] sm:$0xff] }
  0xc8   :  { %v3085_v19 = vpop.permute.xlu1 %553 }
  0xcd   :  { %303 = vxpose.xlu0.b32.cont [8/16] (narrow) %v255_v15, 32  ;;  %274 = vxpose.xlu2.b32.cont [11/16] (narrow) %v242_v18, 32 }
  0xce   :  { %513 = vperm.xlu1 %2727, %v387_v16  }
  0xd0   :  { %v3099_v30 = vpop.permute.xlu1 %458 }
  0xd5   :  { %304 = vxpose.xlu0.b32.cont [9/16] (narrow) %v256_v25, 32  ;;  %275 = vxpose.xlu2.b32.cont [12/16] (narrow) %v243_v27, 32  ;;  %v1022_v25 = vld [vmem:[%s4413_s5 + $0xf8] sm:$0xff] }
  0xd6   :  { %418 = vperm.xlu1 %2727, %v368_v26  }
  0xd8   :  { %v3117_v40 = vpop.permute.xlu1 %463 }
  0xdd   :  { %305 = vxpose.xlu0.b32.cont [10/16] (narrow) %v257_v34, 32  ;;  %276 = vxpose.xlu2.b32.cont [13/16] (narrow) %v244_v35, 32 }
  0xde   :  { %498 = vperm.xlu1 %2727, %v384_v36   ;;  %v1020_v36 = vld [vmem:[%s4413_s5 + $0xe8] sm:$0xff] }
  0xe0   :  { %v3137_v52 = vpop.permute.xlu1 %538 }
  0xe5   :  { %306 = vxpose.xlu0.b32.cont [11/16] (narrow) %v258_v43, 32  ;;  %277 = vxpose.xlu2.b32.cont [14/16] (narrow) %v245_v45, 32 }
  0xe6   :  { %503 = vperm.xlu1 %2727, %v385_v44   ;;  %v1000_v44 = vld [vmem:[%s4413_s5 + $0x48] sm:$0xff] }
  0xe8   :  { %v3154_v62 = vpop.permute.xlu1 %543 }
  0xed   :  { %307 = vxpose.xlu0.b32.cont [12/16] (narrow) %v259_v49, 32  ;;  %278 = vxpose.xlu2.b32.cont [15/16] (narrow) %v246_v51, 32  ;;  %v2582_v49 = vld [vmem:[%s4410_s2 + $0x10] sm:$0xff] }
  0xee   :  { %408 = vperm.xlu1 %2727, %v366_v53   ;;  %v1014_v53 = vld [vmem:[%s4413_s5 + $0xb8] sm:$0xff] }
  0xf0   :  { %v3164_v3 = vpop.permute.xlu1 %448 }
  0xf5   :  { %308 = vxpose.xlu0.b32.cont [13/16] (narrow) %v260_v58, 32  ;;  %279 = vxpose.xlu2.b32.end [16/16] (narrow) %v247_v61, 32  ;;  %v991_v58 = vld [vmem:[%s4413_s5] sm:$0xff] }
  0xf6   :  { %413 = vperm.xlu1 %2727, %v367_v60   ;;  %v2584_v60 = vld [vmem:[%s4410_s2 + $0x20] sm:$0xff] }
  0xf8   :  { %v3177_v12 = vpop.permute.xlu1 %453 }
  0xfd   :  { %309 = vxpose.xlu0.b32.cont [14/16] (narrow) %v261_v0, 32 }
  0xfe   :  { %488 = vperm.xlu1 %2727, %v382_v1   ;;  %v2585_v1 = vld [vmem:[%s4410_s2 + $0x28] sm:$0xff] }
 0x100   :  { %v3183_v15 = vpop.permute.xlu1 %528 }
 0x105   :  { %310 = vxpose.xlu0.b32.cont [15/16] (narrow) %v262_v6, 32  ;;  %v1817_v6 = vld [vmem:[%s4415_s7 + $0x30] sm:$0xff] }
 0x106   :  { %493 = vperm.xlu1 %2727, %v383_v7   ;;  %v2586_v7 = vld [vmem:[%s4410_s2 + $0x30] sm:$0xff] }
 0x108   :  { %v3191_v18 = vpop.permute.xlu1 %533 }
 0x10d   :  { %311 = vxpose.xlu0.b32.end [16/16] (narrow) %v263_v13, 32 }
 0x10e   :  { %398 = vperm.xlu1 %2727, %v364_v14   ;;  %v1811_v14 = vld [vmem:[%s4415_s7] sm:$0xff] }
 0x110   :  { %v3196_v24 = vpop.permute.xlu1 %438 }
 0x116   :  { %v280_v16 = vpop.trf.xlu2  ;;  %403 = vperm.xlu1 %2727, %v365_v42   ;;  %v2587_v42 = vld [vmem:[%s4410_s2 + $0x38] sm:$0xff] }
 0x118   :  { %v3201_v28 = vpop.permute.xlu1 %443 }
 0x11e   :  { %v281_v20 = vpop.trf.xlu2  ;;  %483 = vperm.xlu1 %2727, %v381_v17  }
 0x11f   :  { %v328_v29 = vpack.c.bf16 %v281_v20, %v280_v16  ;;  %v389_v16 = vld [vmem:[%s4411_s3 + $0xc8] sm:$0xff]  ;;  %v380_v20 = vld [vmem:[%s4411_s3 + $0x80] sm:$0xff] }
 0x120   :  { %v3210_v35 = vpop.permute.xlu1 %518 }
 0x126   :  { %v282_v23 = vpop.trf.xlu2  ;;  %1100 = vperm.xlu1 %2727, %v1006_v22  }
 0x128   :  { %v3221_v41 = vpop.permute.xlu1 %428 }
 0x12e   :  { %v283_v26 = vpop.trf.xlu2  ;;  %1180 = vperm.xlu1 %2727, %v1022_v25  }
 0x12f   :  { %v330_v27 = vpack.c.bf16 %v283_v26, %v282_v23  ;;  %v2588_v23 = vld [vmem:[%s4410_s2 + $0x40] sm:$0xff]  ;;  %v1005_v26 = vld [vmem:[%s4413_s5 + $0x70] sm:$0xff] }
 0x130   :  { %v3227_v45 = vpop.permute.xlu1 %433 }
 0x131   :  { %691 = vmatpush.bf16.msra.mxu0 %v330_v27 }
 0x135   :  { %692 = vmatpush.bf16.msra.mxu0 %v328_v29 }
 0x136   :  { %1090 = vperm.xlu1 %2727, %v1004_v31  }
 0x138   :  { %2356 = vmatmul.msk.bf16.vlgmr.msra.gmra.mxu0 %vm636_vm1, %v2580_v32  ;;  %v3237_v51 = vpop.permute.xlu1 %508 }
 0x139   :  { %v312_v34 = vpop.trf.xlu0 }
 0x13e   :  { %1170 = vperm.xlu1 %2727, %v1020_v36  }
 0x140   :  { %v3243_v33 = vpop.permute.xlu1 %513 }
 0x141   :  { %v313_v37 = vpop.trf.xlu0 }
 0x142   :  { %v329_v48 = vpack.c.bf16 %v313_v37, %v312_v34 }
 0x146   :  { %1155 = vperm.xlu1 %2727, %v1017_v38  }
 0x148   :  { %2357 = vmatmul.msk.bf16.gmra.mxu0 %vm636_vm1, %v2581_v39  ;;  %v3256_v57 = vpop.permute.xlu1 %418 }
 0x149   :  { %v314_v43 = vpop.trf.xlu0 }
 0x14e   :  { %1070 = vperm.xlu1 %2727, %v1000_v44  }
 0x150   :  { %v3265_v61 = vpop.permute.xlu1 %498 }
 0x151   :  { %v315_v46 = vpop.trf.xlu0 }
 0x152   :  { %v331_v9 = vpack.c.bf16 %v315_v46, %v314_v43  ;;  %v2589_v43 = vld [vmem:[%s4410_s2 + $0x48] sm:$0xff]  ;;  %v1003_v46 = vld [vmem:[%s4413_s5 + $0x60] sm:$0xff] }
 0x154   :  { %780 = vmatpush.bf16.msra.mxu1 %v331_v9  ;;  %v999_v9 = vld [vmem:[%s4413_s5 + $0x40] sm:$0xff] }
 0x156   :  { %1055 = vperm.xlu1 %2727, %v997_v47  }
 0x157   :  { %2728 = vset.pattern.permute.xlu2 %v2757_v21 }
 0x158   :  { %2358 = vmatmul.msk.bf16.gmra.mxu0 %vm636_vm1, %v2582_v49  ;;  %781 = vmatpush.bf16.msra.mxu1 %v329_v48  ;;  %v3275_v0 = vpop.permute.xlu1 %503 }
 0x15b   :  { %2372 = vmatmul.msk.bf16.vlgmr.msra.gmra.mxu1 %vm636_vm1, %v2580_v32  ;;  %v1021_v32 = vld [vmem:[%s4413_s5 + $0xf0] sm:$0xff] }
 0x15e   :  { %1140 = vperm.xlu1 %2727, %v1014_v53   ;;  %523 = vperm.xlu2 %2728, %v389_v16   ;;  %v1019_v53 = vld [vmem:[%s4413_s5 + $0xe0] sm:$0xff] }
 0x160   :  { %v3284_v2 = vpop.permute.xlu1 %408 }
 0x166   :  { %1125 = vperm.xlu1 %2727, %v1011_v54   ;;  %478 = vperm.xlu2 %2728, %v380_v20   ;;  %v996_v20 = vld [vmem:[%s4413_s5 + $0x28] sm:$0xff] }
 0x168   :  { %2359 = vmatmul.msk.bf16.gmra.mxu0 %vm636_vm1, %v2583_v55  ;;  %v3296_v10 = vpop.permute.xlu1 %413 }
 0x16b   :  { %2373 = vmatmul.msk.bf16.gmra.mxu1 %vm636_vm1, %v2581_v39  ;;  %v1002_v39 = vld [vmem:[%s4413_s5 + $0x58] sm:$0xff] }
 0x16e   :  { %1040 = vperm.xlu1 %2727, %v994_v56   ;;  %1095 = vperm.xlu2 %2728, %v1005_v26   ;;  %v1015_v26 = vld [vmem:[%s4413_s5 + $0xc0] sm:$0xff] }
 0x170   :  { %v3303_v13 = vpop.permute.xlu1 %488 }
 0x174   :  { %2729 = vset.pattern.permute.xlu0 %v2757_v21  ;;  %v1823_v21 = vld [vmem:[%s4415_s7 + $0x60] sm:$0xff] }
 0x176   :  { %1025 = vperm.xlu1 %2727, %v991_v58   ;;  %1175 = vperm.xlu2 %2728, %v1021_v32   ;;  %v1016_v58 = vld [vmem:[%s4413_s5 + $0xc8] sm:$0xff] }
 0x178   :  { %2360 = vmatmul.msk.bf16.gmra.mxu0 %vm636_vm1, %v2584_v60  ;;  %v3315_v17 = vpop.permute.xlu1 %493 }
 0x17b   :  { %423 = vperm.xlu0 %2729, %v369_v63   ;;  %2374 = vmatmul.msk.bf16.gmra.mxu1 %vm636_vm1, %v2582_v49 }
 0x17e   :  { %1110 = vperm.xlu1 %2727, %v1008_v8   ;;  %1085 = vperm.xlu2 %2728, %v1003_v46   ;;  %v1001_v8 = vld [vmem:[%s4413_s5 + $0x50] sm:$0xff] }
 0x180   :  { %v399_v22 = vpop.permute.xlu1 %398 }
 0x183   :  { %1080 = vperm.xlu0 %2729, %v1002_v39  }
 0x186   :  { %1889 = vperm.xlu1 %2727, %v1823_v21   ;;  %1165 = vperm.xlu2 %2728, %v1019_v53  }
 0x188   :  { %2361 = vmatmul.msk.bf16.gmra.mxu0 %vm636_vm1, %v2585_v1  ;;  %v404_v29 = vpop.permute.xlu1 %403 }
 0x18b   :  { %2375 = vmatmul.msk.bf16.gmra.mxu1 %vm636_vm1, %v2583_v55  ;;  %1065 = vperm.xlu0 %2729, %v999_v9  }
 0x18e   :  { %1884 = vperm.xlu1 %2727, %v1822_v4   ;;  %1075 = vperm.xlu2 %2728, %v1001_v8   ;;  %v2592_v8 = vld [vmem:[%s4410_s2 + $0x60] sm:$0xff] }
 0x193   :  { %1150 = vperm.xlu0 %2729, %v1016_v58  }
 0x196   :  { %1859 = vperm.xlu1 %2727, %v1817_v6  }
 0x198   :  { %2362 = vmatmul.msk.bf16.gmra.mxu0 %vm636_vm1, %v2586_v7 }
 0x19b   :  { %2376 = vmatmul.msk.bf16.gmra.mxu1 %vm636_vm1, %v2584_v60  ;;  %v2590_v60 = vld [vmem:[%s4410_s2 + $0x50] sm:$0xff] }
 0x19e   :  { %1854 = vperm.xlu1 %2727, %v1816_v11  }
 0x1a6   :  { %1829 = vperm.xlu1 %2727, %v1811_v14  }
 0x1a8   :  { %2363 = vmatmul.msk.bf16.gmra.mxu0 %vm636_vm1, %v2587_v42 }
 0x1ab   :  { %2377 = vmatmul.msk.bf16.gmra.mxu1 %vm636_vm1, %v2585_v1  ;;  %v1013_v1 = vld [vmem:[%s4413_s5 + $0xb0] sm:$0xff] }
 0x1ac   :  { %1135 = vperm.xlu0 %2729, %v1013_v1  }
 0x1b4   :  { %1050 = vperm.xlu0 %2729, %v996_v20  }
 0x1b5   :  { %v694_v25 = vpop.f32.mrf.mxu0 }
 0x1b6   :  { %v695_v27 = vadd.f32 %v694_v25, %v399_v22 }
 0x1b8   :  { %2364 = vmatmul.msk.bf16.gmra.mxu0 %vm636_vm1, %v2588_v23  ;;  %v863_v36 = vmax.f32 %v695_v27, 0.0 }
 0x1bb   :  { %2378 = vmatmul.msk.bf16.gmra.mxu1 %vm636_vm1, %v2586_v7  ;;  %v1018_v7 = vld [vmem:[%s4413_s5 + $0xd8] sm:$0xff] }
 0x1bc   :  { %1160 = vperm.xlu2 %2728, %v1018_v7  }
 0x1bd   :  { %v696_v31 = vpop.f32.mrf.mxu0 }
 0x1be   :  { %v697_v34 = vadd.f32 %v696_v31, %v404_v29  ;;  %v993_v31 = vld [vmem:[%s4413_s5 + $0x10] sm:$0xff] }
 0x1bf   :  { %1035 = vperm.xlu0 %2729, %v993_v31  }
 0x1c0   :  { %v865_v37 = vmax.f32 %v697_v34, 0.0 }
 0x1c2   :  { %v3332_v38 = vpack.c.bf16 %v865_v37, %v863_v36 }
 0x1c4   :  { %1145 = vperm.xlu2 %2728, %v1015_v26   ;;  %v2593_v26 = vld [vmem:[%s4410_s2 + $0x68] sm:$0xff] }
 0x1c5   :  { %v699_v44 = vpop.f32.mrf.mxu0 }
 0x1c6   :  { %v700_v47 = vadd.f32 %v699_v44, %v3284_v2 }
 0x1c8   :  { %2365 = vmatmul.msk.bf16.gmra.mxu0 %vm636_vm1, %v2589_v43  ;;  %v867_v54 = vmax.f32 %v700_v47, 0.0 }
 0x1cb   :  { %2379 = vmatmul.msk.bf16.gmra.mxu1 %vm636_vm1, %v2587_v42 }
 0x1cd   :  { %v701_v48 = vpop.f32.mrf.mxu0 }
 0x1ce   :  { %v702_v49 = vadd.f32 %v701_v48, %v3296_v10 }
 0x1d0   :  { %v869_v55 = vmax.f32 %v702_v49, 0.0 }
 0x1d2   :  { %v3353_v56 = vpack.c.bf16 %v869_v55, %v867_v54 }
 0x1d5   :  { %v704_v63 = vpop.f32.mrf.mxu0 }
 0x1d6   :  { %v705_v32 = vadd.f32 %v704_v63, %v3256_v57  ;;  %v1010_v63 = vld [vmem:[%s4413_s5 + $0x98] sm:$0xff] }
 0x1d7   :  { %1120 = vperm.xlu0 %2729, %v1010_v63   ;;  %v2595_v63 = vld [vmem:[%s4410_s2 + $0x78] sm:$0xff] }
 0x1d8   :  { %2366 = vmatmul.msk.bf16.gmra.mxu0 %vm636_vm1, %v2590_v60  ;;  %v783_v21 = vpop.f32.mrf.mxu1 }
 0x1d9   :  { %v784_v4 = vadd.f32 %v783_v21, %v399_v22 }
 0x1db   :  { %2380 = vmatmul.msk.bf16.gmra.mxu1 %vm636_vm1, %v2588_v23  ;;  %v864_v14 = vmax.f32 %v784_v4, 0.0  ;;  %v2591_v23 = vld [vmem:[%s4410_s2 + $0x58] sm:$0xff] }
 0x1dd   :  { %v706_v6 = vpop.f32.mrf.mxu0 }
 0x1e0   :  { %v785_v11 = vpop.f32.mrf.mxu1 }
 0x1e1   :  { %v786_v42 = vadd.f32 %v785_v11, %v404_v29  ;;  %v1012_v11 = vld [vmem:[%s4413_s5 + $0xa8] sm:$0xff] }
 0x1e3   :  { %v866_v16 = vmax.f32 %v786_v42, 0.0 }
 0x1e5   :  { %v709_v22 = vpop.f32.mrf.mxu0  ;;  %v3378_v25 = vpack.c.bf16 %v866_v16, %v864_v14 }
 0x1e6   :  { %v710_v34 = vadd.f32 %v709_v22, %v3221_v41 }
 0x1e8   :  { %2367 = vmatmul.msk.bf16.gmra.mxu0 %vm636_vm1, %v2591_v23  ;;  %v788_v27 = vpop.f32.mrf.mxu1  ;;  %v875_v46 = vmax.f32 %v710_v34, 0.0 }
 0x1e9   :  { %v789_v29 = vadd.f32 %v788_v27, %v3284_v2  ;;  %v998_v2 = vld [vmem:[%s4413_s5 + $0x38] sm:$0xff] }
 0x1ea   :  { %1060 = vperm.xlu2 %2728, %v998_v2  }
 0x1eb   :  { %2381 = vmatmul.msk.bf16.gmra.mxu1 %vm636_vm1, %v2589_v43  ;;  %v871_v43 = vmax.f32 %v705_v32, 0.0  ;;  %v868_v55 = vmax.f32 %v789_v29, 0.0  ;;  %v1821_v32 = vld [vmem:[%s4415_s7 + $0x50] sm:$0xff] }
 0x1ed   :  { %v424_v36 = vpop.permute.xlu0 %423  ;;  %v711_v37 = vpop.f32.mrf.mxu0 }
 0x1ee   :  { %v707_v39 = vadd.f32 %v706_v6, %v424_v36  ;;  %v712_v44 = vadd.f32 %v711_v37, %v3227_v45  ;;  %v1007_v6 = vld [vmem:[%s4413_s5 + $0x80] sm:$0xff] }
 0x1ef   :  { %1105 = vperm.xlu0 %2729, %v1007_v6  }
 0x1f0   :  { %v873_v9 = vmax.f32 %v707_v39, 0.0  ;;  %v877_v47 = vmax.f32 %v712_v44, 0.0  ;;  %v790_v48 = vpop.f32.mrf.mxu1 }
 0x1f1   :  { %v791_v49 = vadd.f32 %v790_v48, %v3296_v10  ;;  %v995_v10 = vld [vmem:[%s4413_s5 + $0x20] sm:$0xff] }
 0x1f2   :  { %v3396_v53 = vpack.c.bf16 %v877_v47, %v875_v46  ;;  %v3398_v54 = vpack.c.bf16 %v873_v9, %v871_v43  ;;  %1045 = vperm.xlu2 %2728, %v995_v10   ;;  %v1820_v46 = vld [vmem:[%s4415_s7 + $0x48] sm:$0xff]  ;;  %v1815_v48 = vld [vmem:[%s4415_s7 + $0x20] sm:$0xff] }
 0x1f3   :  { %v870_v58 = vmax.f32 %v791_v49, 0.0 }
 0x1f5   :  { %v3406_v21 = vpop.f32.mrf.mxu0  ;;  %v3408_v1 = vpack.c.bf16 %v870_v58, %v868_v55  ;;  %v1824_v55 = vld [vmem:[%s4415_s7 + $0x68] sm:$0xff] }
 0x1f8   :  { %2368 = vmatmul.msk.bf16.gmra.mxu0 %vm636_vm1, %v2592_v8  ;;  %v793_v4 = vpop.f32.mrf.mxu1 }
 0x1f9   :  { %v794_v14 = vadd.f32 %v793_v4, %v3256_v57  ;;  %v1009_v57 = vld [vmem:[%s4413_s5 + $0x90] sm:$0xff]  ;;  %v1819_v4 = vld [vmem:[%s4415_s7 + $0x40] sm:$0xff] }
 0x1fa   :  { %1130 = vperm.xlu2 %2728, %v1012_v11  }
 0x1fb   :  { %2382 = vmatmul.msk.bf16.gmra.mxu1 %vm636_vm1, %v2590_v60  ;;  %v872_v20 = vmax.f32 %v794_v14, 0.0  ;;  %v1826_v60 = vld [vmem:[%s4415_s7 + $0x78] sm:$0xff]  ;;  %v2232_v14 = vld [vmem:[#allocation2] sm:$0x1] }
 0x1fc   :  { %1904 = vperm.xlu0 %2729, %v1826_v60  }
 0x1fd   :  { %v3418_v7 = vpop.f32.mrf.mxu0 }
 0x200   :  { %v795_v42 = vpop.f32.mrf.mxu1 }
 0x201   :  { %v796_v16 = vadd.f32 %v795_v42, %v424_v36  ;;  %v992_v36 = vld [vmem:[%s4413_s5 + $0x8] sm:$0xff] }
 0x202   :  { %1115 = vperm.xlu2 %2728, %v1009_v57  }
 0x203   :  { %v874_v22 = vmax.f32 %v796_v16, 0.0 }
 0x204   :  { %1879 = vperm.xlu0 %2729, %v1821_v32  }
 0x205   :  { %v719_v27 = vpop.f32.mrf.mxu0  ;;  %v3430_v29 = vpack.c.bf16 %v874_v22, %v872_v20  ;;  %v1818_v22 = vld [vmem:[%s4415_s7 + $0x38] sm:$0xff] }
 0x208   :  { %2369 = vmatmul.msk.bf16.gmra.mxu0 %vm636_vm1, %v2593_v26  ;;  %v798_v31 = vpop.f32.mrf.mxu1 }
 0x209   :  { %v799_v37 = vadd.f32 %v798_v31, %v3221_v41  ;;  %v1825_v41 = vld [vmem:[%s4415_s7 + $0x70] sm:$0xff] }
 0x20a   :  { %1030 = vperm.xlu2 %2728, %v992_v36  }
 0x20b   :  { %2383 = vmatmul.msk.bf16.gmra.mxu1 %vm636_vm1, %v2591_v23  ;;  %v876_v2 = vmax.f32 %v799_v37, 0.0  ;;  %v2594_v23 = vld [vmem:[%s4410_s2 + $0x70] sm:$0xff] }
 0x20c   :  { %1874 = vperm.xlu0 %2729, %v1820_v46  }
 0x20d   :  { %v721_v34 = vpop.f32.mrf.mxu0 }
 0x210   :  { %v800_v39 = vpop.f32.mrf.mxu1 }
 0x211   :  { %v801_v44 = vadd.f32 %v800_v39, %v3227_v45  ;;  %v720_v39 = vadd.f32 %v719_v27, %v3164_v3 }
 0x212   :  { %1899 = vperm.xlu2 %2728, %v1825_v41  }
 0x213   :  { %v878_v43 = vmax.f32 %v801_v44, 0.0 }
 0x214   :  { %1849 = vperm.xlu0 %2729, %v1815_v48   ;;  %v883_v48 = vmax.f32 %v720_v39, 0.0 }
 0x215   :  { %v724_v9 = vpop.f32.mrf.mxu0  ;;  %v3451_v47 = vpack.c.bf16 %v878_v43, %v876_v2  ;;  %v717_v43 = vadd.f32 %v3418_v7, %v3201_v28 }
 0x216   :  { %v725_v60 = vadd.f32 %v724_v9, %v3099_v30  ;;  %v1813_v9 = vld [vmem:[%s4415_s7 + $0x10] sm:$0xff] }
 0x217   :  { %v881_v27 = vmax.f32 %v717_v43, 0.0 }
 0x218   :  { %2370 = vmatmul.msk.bf16.gmra.mxu0 %vm636_vm1, %v2594_v23  ;;  %v3457_v45 = vpop.f32.mrf.mxu1  ;;  %v887_v44 = vmax.f32 %v725_v60, 0.0 }
 0x21a   :  { %1894 = vperm.xlu2 %2728, %v1824_v55  }
 0x21b   :  { %2384 = vmatmul.msk.bf16.gmra.mxu1 %vm636_vm1, %v2592_v8  ;;  %v1814_v8 = vld [vmem:[%s4415_s7 + $0x18] sm:$0xff] }
 0x21c   :  { %1844 = vperm.xlu0 %2729, %v1814_v8  }
 0x21d   :  { %v726_v49 = vpop.f32.mrf.mxu0 }
 0x21e   :  { %v727_v16 = vadd.f32 %v726_v49, %v3117_v40 }
 0x220   :  { %v3466_v58 = vpop.f32.mrf.mxu1  ;;  %v889_v36 = vmax.f32 %v727_v16, 0.0 }
 0x222   :  { %1869 = vperm.xlu2 %2728, %v1819_v4   ;;  %v939_v41 = vpack.c.bf16 %v889_v36, %v887_v44  ;;  %v1812_v4 = vld [vmem:[%s4415_s7 + $0x8] sm:$0xff]  ;;  %v804_v44 = vadd.f32 %v3457_v45, %v3196_v24 }
 0x224   :  { %2235 = vperm.xlu0 %2729, %v2232_v14  }
 0x225   :  { %v729_v10 = vpop.f32.mrf.mxu0 }
 0x226   :  { %v730_v11 = vadd.f32 %v729_v10, %v3036_v50 }
 0x228   :  { %2371 = vmatmul.msk.bf16.gmra.mxu0 %vm636_vm1, %v2595_v63  ;;  %v3478_v6 = vpop.f32.mrf.mxu1  ;;  %v891_v57 = vmax.f32 %v730_v11, 0.0 }
 0x22a   :  { %1864 = vperm.xlu2 %2728, %v1818_v22  }
 0x22b   :  { %2385 = vmatmul.msk.bf16.gmra.mxu1 %vm636_vm1, %v2593_v26  ;;  %v722_v26 = vadd.f32 %v721_v34, %v3177_v12  ;;  %v715_v34 = vadd.f32 %v3406_v21, %v3196_v24 }
 0x22d   :  { %v731_v42 = vpop.f32.mrf.mxu0  ;;  %v885_v46 = vmax.f32 %v722_v26, 0.0  ;;  %v879_v8 = vmax.f32 %v715_v34, 0.0  ;;  %v2406_v34 = vld [vmem:[%s4412_s4 + $0x20] sm:$0xf] }
 0x22e   :  { %v732_v20 = vadd.f32 %v731_v42, %v3049_v59  ;;  %v2597_v42 = vld [vmem:[%s4412_s4 + $0x4] sm:$0xf0] }
 0x22f   :  { %v937_v55 = vpack.c.bf16 %v885_v46, %v883_v48  ;;  %v935_v10 = vpack.c.bf16 %v881_v27, %v879_v8  ;;  %v2601_v48 = vld [vmem:[%s4412_s4 + $0x24] sm:$0xf0]  ;;  %v2414_v8 = vld [vmem:[%s4412_s4 + $0x30] sm:$0xf] }
 0x230   :  { %v810_v31 = vpop.f32.mrf.mxu1  ;;  %v893_v32 = vmax.f32 %v732_v20, 0.0  ;;  %v2407_v27 = vor.u32 %v2601_v48, %v2406_v34 }
 0x232   :  { %v941_v37 = vpack.c.bf16 %v893_v32, %v891_v57  ;;  %1839 = vperm.xlu2 %2728, %v1813_v9   ;;  %v811_v32 = vadd.f32 %v810_v31, %v3177_v12  ;;  %v2398_v31 = vld [vmem:[%s4412_s4 + $0x10] sm:$0xf] }
 0x234   :  { %1343 = vmatpush.bf16.msra.mxu2 %v941_v37 }
 0x235   :  { %v3490_v2 = vpop.f32.mrf.mxu0 }
 0x238   :  { %v813_v49 = vpop.f32.mrf.mxu1  ;;  %1344 = vmatpush.bf16.msra.mxu2 %v939_v41 }
 0x23a   :  { %1834 = vperm.xlu2 %2728, %v1812_v4  }
 0x23b   :  { %2386 = vmatmul.msk.bf16.gmra.mxu1 %vm636_vm1, %v2594_v23  ;;  %v2390_v23 = vld [vmem:[%s4412_s4] sm:$0xf] }
 0x23c   :  { %1345 = vmatpush.bf16.msra.mxu2 %v937_v55  ;;  %v2391_v20 = vor.u32 %v2597_v42, %v2390_v23  ;;  %v2422_v23 = vld [vmem:[%s4412_s4 + $0x40] sm:$0xf]  ;;  %v2605_v42 = vld [vmem:[%s4412_s4 + $0x44] sm:$0xf0] }
 0x23d   :  { %v3500_v7 = vpop.f32.mrf.mxu0 }
 0x240   :  { %v815_v11 = vpop.f32.mrf.mxu1  ;;  %1346 = vmatpush.bf16.msra.mxu2 %v935_v10  ;;  %v2603_v10 = vld [vmem:[%s4412_s4 + $0x34] sm:$0xf0] }
 0x244   :  { %1347 = vmatpush.bf16.msra.mxu2 %v3396_v53 }
 0x245   :  { %v3506_v21 = vpop.f32.mrf.mxu0 }
 0x248   :  { %v818_v14 = vpop.f32.mrf.mxu1  ;;  %1348 = vmatpush.bf16.msra.mxu2 %v3398_v54  ;;  %v816_v54 = vadd.f32 %v815_v11, %v3117_v40 }
 0x249   :  { %v819_v53 = vadd.f32 %v818_v14, %v3036_v50  ;;  %v809_v50 = vadd.f32 %v3478_v6, %v3164_v3  ;;  %v2599_v3 = vld [vmem:[%s4412_s4 + $0x14] sm:$0xf0] }
 0x24a   :  { %v890_v26 = vmax.f32 %v816_v54, 0.0 }
 0x24b   :  { %2387 = vmatmul.msk.bf16.gmra.mxu1 %vm636_vm1, %v2595_v63  ;;  %v814_v63 = vadd.f32 %v813_v49, %v3099_v30  ;;  %v892_v60 = vmax.f32 %v819_v53, 0.0  ;;  %v886_v30 = vmax.f32 %v811_v32, 0.0  ;;  %v884_v12 = vmax.f32 %v809_v50, 0.0 }
 0x24c   :  { %1349 = vmatpush.bf16.msra.mxu2 %v3353_v56 }
 0x24d   :  { %v3517_v16 = vpop.f32.mrf.mxu0  ;;  %v888_v39 = vmax.f32 %v814_v63, 0.0  ;;  %v938_v46 = vpack.c.bf16 %v886_v30, %v884_v12  ;;  %v2430_v63 = vld [vmem:[%s4412_s4 + $0x50] sm:$0xf]  ;;  %v2609_v30 = vld [vmem:[%s4412_s4 + $0x64] sm:$0xf0] }
 0x24f   :  { %v940_v40 = vpack.c.bf16 %v890_v26, %v888_v39 }
 0x250   :  { %v820_v22 = vpop.f32.mrf.mxu1  ;;  %1350 = vmatpush.bf16.msra.mxu2 %v3332_v38 }
 0x251   :  { %v821_v56 = vadd.f32 %v820_v22, %v3049_v59  ;;  %v806_v59 = vadd.f32 %v3466_v58, %v3201_v28  ;;  %v880_v28 = vmax.f32 %v804_v44, 0.0  ;;  %v2399_v58 = vor.u32 %v2599_v3, %v2398_v31 }
 0x253   :  { %v894_v57 = vmax.f32 %v821_v56, 0.0  ;;  %1351 = vmatmul.bf16.vlgmr.msra.gmra.mxu2 %v2391_v20  ;;  %v882_v6 = vmax.f32 %v806_v59, 0.0  ;;  %v2438_v59 = vld [vmem:[%s4412_s4 + $0x60] sm:$0xf] }
 0x254   :  { %v3604_v31 = vor.u32 %v2609_v30, %v2438_v59 }
 0x255   :  { %v3525_v36 = vpop.f32.mrf.mxu0  ;;  %v942_v37 = vpack.c.bf16 %v894_v57, %v892_v60  ;;  %v936_v24 = vpack.c.bf16 %v882_v6, %v880_v28  ;;  %v2607_v60 = vld [vmem:[%s4412_s4 + $0x54] sm:$0xf0] }
 0x256   :  { %v2431_v32 = vor.u32 %v2607_v60, %v2430_v63 }
 0x257   :  { %1521 = vmatpush.bf16.msrb.mxu0 %v942_v37 }
 0x258   :  { %v3529_v38 = vpop.f32.mrf.mxu1 }
 0x25b   :  { %1522 = vmatpush.bf16.msrb.mxu0 %v940_v40 }
 0x25d   :  { %v3541_v43 = vpop.f32.mrf.mxu0 }
 0x25f   :  { %1523 = vmatpush.bf16.msrb.mxu0 %v938_v46 }
 0x260   :  { %v3543_v41 = vpop.f32.mrf.mxu1 }
 0x263   :  { %1356 = vmatmul.bf16.gmra.mxu2 %v2399_v58  ;;  %1524 = vmatpush.bf16.msrb.mxu0 %v936_v24 }
 0x265   :  { %v3545_v45 = vpop.f32.mrf.mxu0 }
 0x267   :  { %1525 = vmatpush.bf16.msrb.mxu0 %v3451_v47 }
 0x268   :  { %v3548_v9 = vpop.f32.mrf.mxu1 }
 0x26b   :  { %1526 = vmatpush.bf16.msrb.mxu0 %v3430_v29 }
 0x26d   :  { %v3557_v49 = vpop.f32.mrf.mxu0 }
 0x26f   :  { %1527 = vmatpush.bf16.msrb.mxu0 %v3408_v1  ;;  %v2415_v1 = vor.u32 %v2603_v10, %v2414_v8  ;;  %v3612_v8 = vpop.permute.xlu2 %523 }
 0x270   :  { %v3560_v55 = vpop.f32.mrf.mxu1 }
 0x273   :  { %1361 = vmatmul.bf16.gmra.mxu2 %v2407_v27  ;;  %1528 = vmatpush.bf16.msrb.mxu0 %v3378_v25 }
 0x275   :  { %v754_v47 = vpop.f32.mrf.mxu0 }
 0x276   :  { %1529 = vmatmul.bf16.vlgmr.msrb.gmra.mxu0 %v2391_v20  ;;  %v2423_v20 = vor.u32 %v2605_v42, %v2422_v23  ;;  %v755_v42 = vadd.f32 %v754_v47, %v3210_v35  ;;  %v2611_v47 = vld [vmem:[%s4412_s4 + $0x74] sm:$0xf0] }
 0x278   :  { %v3563_v29 = vpop.f32.mrf.mxu1 }
 0x27d   :  { %v756_v4 = vpop.f32.mrf.mxu0 }
 0x27e   :  { %v757_v10 = vadd.f32 %v756_v4, %v3612_v8  ;;  %v2446_v4 = vld [vmem:[%s4412_s4 + $0x70] sm:$0xf] }
 0x27f   :  { %v3628_v59 = vor.u32 %v2611_v47, %v2446_v4 }
 0x280   :  { %v3571_v11 = vpop.f32.mrf.mxu1  ;;  %v913_v60 = vmax.f32 %v757_v10, 0.0 }
 0x283   :  { %1366 = vmatmul.bf16.gmra.mxu2 %v2415_v1 }
 0x285   :  { %v759_v14 = vpop.f32.mrf.mxu0 }
 0x286   :  { %1534 = vmatmul.bf16.gmra.mxu0 %v2399_v58  ;;  %v760_v48 = vadd.f32 %v759_v14, %v3183_v15  ;;  %v750_v14 = vadd.f32 %v3545_v45, %v3237_v51  ;;  %v745_v45 = vadd.f32 %v3525_v36, %v3265_v61 }
 0x288   :  { %v3573_v25 = vpop.f32.mrf.mxu1  ;;  %v907_v30 = vmax.f32 %v750_v14, 0.0 }
 0x28d   :  { %v761_v53 = vpop.f32.mrf.mxu0 }
 0x28e   :  { %v762_v58 = vadd.f32 %v761_v53, %v3191_v18  ;;  %v752_v53 = vadd.f32 %v3557_v49, %v3243_v33 }
 0x290   :  { %v3581_v22 = vpop.f32.mrf.mxu1 }
 0x293   :  { %1371 = vmatmul.bf16.gmra.mxu2 %v2423_v20 }
 0x295   :  { %v764_v54 = vpop.f32.mrf.mxu0 }
 0x296   :  { %1539 = vmatmul.bf16.gmra.mxu0 %v2407_v27  ;;  %v765_v3 = vadd.f32 %v764_v54, %v3137_v52  ;;  %v915_v54 = vmax.f32 %v760_v48, 0.0 }
 0x298   :  { %v3583_v56 = vpop.f32.mrf.mxu1  ;;  %v919_v27 = vmax.f32 %v765_v3, 0.0 }
 0x29d   :  { %v766_v57 = vpop.f32.mrf.mxu0 }
 0x29e   :  { %v767_v44 = vadd.f32 %v766_v57, %v3154_v62 }
 0x2a0   :  { %v3591_v26 = vpop.f32.mrf.mxu1  ;;  %v921_v24 = vmax.f32 %v767_v44, 0.0  ;;  %v742_v44 = vadd.f32 %v3517_v16, %v3315_v17 }
 0x2a2   :  { %v955_v23 = vpack.c.bf16 %v921_v24, %v919_v27  ;;  %v901_v24 = vmax.f32 %v742_v44, 0.0 }
 0x2a3   :  { %1376 = vmatmul.bf16.gmra.mxu2 %v2431_v32 }
 0x2a5   :  { %v769_v37 = vpop.f32.mrf.mxu0 }
 0x2a6   :  { %1544 = vmatmul.bf16.gmra.mxu0 %v2415_v1  ;;  %v770_v39 = vadd.f32 %v769_v37, %v3067_v5  ;;  %v917_v1 = vmax.f32 %v762_v58, 0.0  ;;  %v911_v37 = vmax.f32 %v755_v42, 0.0  ;;  %v3639_v58 = vpop.permute.xlu2 %478 }
 0x2a7   :  { %v735_v16 = vadd.f32 %v3490_v2, %v3639_v58  ;;  %v2392_v2 = vld [vmem:[%s4412_s4 + $0x8] sm:$0xf0] }
 0x2a8   :  { %v3593_v50 = vpop.f32.mrf.mxu1  ;;  %v923_v6 = vmax.f32 %v770_v39, 0.0  ;;  %v953_v57 = vpack.c.bf16 %v917_v1, %v915_v54  ;;  %v909_v39 = vmax.f32 %v752_v53, 0.0  ;;  %v951_v49 = vpack.c.bf16 %v913_v60, %v911_v37 }
 0x2a9   :  { %v895_v1 = vmax.f32 %v735_v16, 0.0 }
 0x2aa   :  { %v949_v3 = vpack.c.bf16 %v909_v39, %v907_v30 }
 0x2ad   :  { %v771_v40 = vpop.f32.mrf.mxu0 }
 0x2ae   :  { %v772_v12 = vadd.f32 %v771_v40, %v3085_v19 }
 0x2b0   :  { %v3607_v46 = vpop.f32.mrf.mxu1  ;;  %v925_v28 = vmax.f32 %v772_v12, 0.0 }
 0x2b2   :  { %v957_v34 = vpack.c.bf16 %v925_v28, %v923_v6  ;;  %v903_v6 = vmax.f32 %v745_v45, 0.0  ;;  %v3637_v28 = vpop.permute.xlu1 %483 }
 0x2b3   :  { %1381 = vmatmul.bf16.gmra.mxu2 %v3604_v31  ;;  %v737_v36 = vadd.f32 %v3500_v7, %v3637_v28  ;;  %v2613_v7 = vld [vmem:[%s4412_s4 + $0x84] sm:$0xf0] }
 0x2b4   :  { %1432 = vmatpush.bf16.msra.mxu3 %v957_v34 }
 0x2b5   :  { %v897_v10 = vmax.f32 %v737_v36, 0.0  ;;  %v834_v36 = vadd.f32 %v3563_v29, %v3265_v61  ;;  %v826_v61 = vadd.f32 %v3543_v41, %v3637_v28  ;;  %v3717_v41 = vpop.permute.xlu2 %1095 }
 0x2b6   :  { %1549 = vmatmul.bf16.gmra.mxu0 %v2423_v20  ;;  %v747_v20 = vadd.f32 %v3541_v43, %v3275_v0  ;;  %v740_v43 = vadd.f32 %v3506_v21, %v3303_v13 }
 0x2b7   :  { %v943_v42 = vpack.c.bf16 %v897_v10, %v895_v1 }
 0x2b8   :  { %v853_v63 = vpop.f32.mrf.mxu1  ;;  %1433 = vmatpush.bf16.msra.mxu3 %v955_v23  ;;  %v905_v12 = vmax.f32 %v747_v20, 0.0  ;;  %v899_v48 = vmax.f32 %v740_v43, 0.0  ;;  %v2454_v23 = vld [vmem:[%s4412_s4 + $0x80] sm:$0xf] }
 0x2b9   :  { %v3658_v53 = vor.u32 %v2613_v7, %v2454_v23  ;;  %v854_v4 = vadd.f32 %v853_v63, %v3137_v52  ;;  %v846_v63 = vadd.f32 %v3591_v26, %v3612_v8  ;;  %v2400_v26 = vld [vmem:[%s4412_s4 + $0x18] sm:$0xf0]  ;;  %v841_v8 = vadd.f32 %v3581_v22, %v3243_v33  ;;  %v2478_v23 = vld [vmem:[%s4412_s4 + $0xb0] sm:$0xf]  ;;  %v2619_v7 = vld [vmem:[%s4412_s4 + $0xb4] sm:$0xf0] }
 0x2ba   :  { %v947_v34 = vpack.c.bf16 %v905_v12, %v903_v6  ;;  %v945_v21 = vpack.c.bf16 %v901_v24, %v899_v48  ;;  %v831_v33 = vadd.f32 %v3560_v55, %v3315_v17  ;;  %v2470_v17 = vld [vmem:[%s4412_s4 + $0xa0] sm:$0xf] }
 0x2bb   :  { %v920_v45 = vmax.f32 %v854_v4, 0.0  ;;  %v910_v43 = vmax.f32 %v841_v8, 0.0 }
 0x2bc   :  { %1434 = vmatpush.bf16.msra.mxu3 %v953_v57  ;;  %v902_v29 = vmax.f32 %v831_v33, 0.0 }
 0x2c0   :  { %v855_v40 = vpop.f32.mrf.mxu1  ;;  %1435 = vmatpush.bf16.msra.mxu3 %v951_v49 }
 0x2c1   :  { %v856_v14 = vadd.f32 %v855_v40, %v3154_v62  ;;  %v849_v62 = vadd.f32 %v3593_v50, %v3183_v15  ;;  %v2615_v15 = vld [vmem:[%s4412_s4 + $0x94] sm:$0xf0]  ;;  %v2598_v50 = vld [vmem:[%s4412_s4 + $0x14] sm:$0xf]  ;;  %v914_v40 = vmax.f32 %v846_v63, 0.0 }
 0x2c3   :  { %1386 = vmatmul.bf16.gmra.mxu2 %v3628_v59  ;;  %v922_v39 = vmax.f32 %v856_v14, 0.0  ;;  %v916_v30 = vmax.f32 %v849_v62, 0.0 }
 0x2c4   :  { %1436 = vmatpush.bf16.msra.mxu3 %v949_v3  ;;  %v836_v3 = vadd.f32 %v3571_v11, %v3275_v0  ;;  %v904_v0 = vmax.f32 %v834_v36, 0.0  ;;  %v824_v11 = vadd.f32 %v3529_v38, %v3639_v58  ;;  %v2408_v38 = vld [vmem:[%s4412_s4 + $0x28] sm:$0xf0] }
 0x2c5   :  { %v956_v52 = vpack.c.bf16 %v922_v39, %v920_v45  ;;  %v2440_v36 = vld [vmem:[%s4412_s4 + $0x68] sm:$0xf0] }
 0x2c6   :  { %1554 = vmatmul.bf16.gmra.mxu0 %v2431_v32  ;;  %v2596_v32 = vld [vmem:[%s4412_s4 + $0x4] sm:$0xf]  ;;  %v906_v22 = vmax.f32 %v836_v3, 0.0  ;;  %v896_v55 = vmax.f32 %v824_v11, 0.0 }
 0x2c7   :  { %v3660_v60 = vor.u32 %v2596_v32, %v2392_v2  ;;  %v2602_v32 = vld [vmem:[%s4412_s4 + $0x34] sm:$0xf]  ;;  %v2416_v2 = vld [vmem:[%s4412_s4 + $0x38] sm:$0xf0] }
 0x2c8   :  { %v858_v27 = vpop.f32.mrf.mxu1  ;;  %1437 = vmatpush.bf16.msra.mxu3 %v947_v34  ;;  %v948_v34 = vpack.c.bf16 %v906_v22, %v904_v0 }
 0x2c9   :  { %v859_v54 = vadd.f32 %v858_v27, %v3067_v5  ;;  %v851_v5 = vadd.f32 %v3607_v46, %v3191_v18  ;;  %v2462_v18 = vld [vmem:[%s4412_s4 + $0x90] sm:$0xf]  ;;  %v844_v46 = vadd.f32 %v3583_v56, %v3210_v35  ;;  %v2403_v35 = vor.u32 %v2598_v50, %v2400_v26  ;;  %v3719_v27 = vpop.permute.xlu1 %1100 }
 0x2ca   :  { %v2463_v44 = vor.u32 %v2615_v15, %v2462_v18  ;;  %v839_v56 = vadd.f32 %v3573_v25, %v3237_v51  ;;  %v829_v25 = vadd.f32 %v3548_v9, %v3303_v13  ;;  %v2617_v13 = vld [vmem:[%s4412_s4 + $0xa4] sm:$0xf0]  ;;  %v2600_v9 = vld [vmem:[%s4412_s4 + $0x24] sm:$0xf]  ;;  %v2623_v18 = vld [vmem:[%s4412_s4 + $0xd4] sm:$0xf0] }
 0x2cb   :  { %v924_v47 = vmax.f32 %v859_v54, 0.0  ;;  %v912_v12 = vmax.f32 %v844_v46, 0.0  ;;  %v2471_v58 = vor.u32 %v2617_v13, %v2470_v17  ;;  %v2411_v48 = vor.u32 %v2600_v9, %v2408_v38  ;;  %v2606_v46 = vld [vmem:[%s4412_s4 + $0x54] sm:$0xf]  ;;  %v2432_v15 = vld [vmem:[%s4412_s4 + $0x58] sm:$0xf0] }
 0x2cc   :  { %1438 = vmatpush.bf16.msra.mxu3 %v945_v21  ;;  %v908_v24 = vmax.f32 %v839_v56, 0.0  ;;  %v900_v16 = vmax.f32 %v829_v25, 0.0  ;;  %v3723_v21 = vpop.permute.xlu2 %1175  ;;  %v2479_v54 = vor.u32 %v2619_v7, %v2478_v23  ;;  %v2435_v26 = vor.u32 %v2606_v46, %v2432_v15  ;;  %v2610_v17 = vld [vmem:[%s4412_s4 + $0x74] sm:$0xf]  ;;  %v2448_v13 = vld [vmem:[%s4412_s4 + $0x78] sm:$0xf0] }
 0x2cd   :  { %v952_v6 = vpack.c.bf16 %v914_v40, %v912_v12  ;;  %4431 = vst [vmem:[#allocation6_spill] sm:$0xff] %v3723_v21  ;;  %v2502_v12 = vld [vmem:[%s4412_s4 + $0xe0] sm:$0xf]  ;;  %v2614_v15 = vld [vmem:[%s4412_s4 + $0x94] sm:$0xf] }
 0x2ce   :  { %v950_v51 = vpack.c.bf16 %v910_v43, %v908_v24  ;;  %v946_v28 = vpack.c.bf16 %v902_v29, %v900_v16  ;;  %v2625_v43 = vld [vmem:[%s4412_s4 + $0xe4] sm:$0xf0]  ;;  %v2510_v29 = vld [vmem:[%s4412_s4 + $0xf0] sm:$0xf]  ;;  %v2627_v16 = vld [vmem:[%s4412_s4 + $0xf4] sm:$0xf0] }
 0x2cf   :  { %v2503_v33 = vor.u32 %v2625_v43, %v2502_v12 }
 0x2d0   :  { %v860_v57 = vpop.f32.mrf.mxu1  ;;  %1439 = vmatpush.bf16.msra.mxu3 %v943_v42 }
 0x2d1   :  { %v861_v37 = vadd.f32 %v860_v57, %v3085_v19  ;;  %v918_v19 = vmax.f32 %v851_v5, 0.0  ;;  %v3725_v1 = vpop.permute.xlu1 %1180  ;;  %v2424_v5 = vld [vmem:[%s4412_s4 + $0x48] sm:$0xf0] }
 0x2d2   :  { %4432 = vst [vmem:[#allocation7_spill] sm:$0xff] %v3725_v1 }
 0x2d3   :  { %v926_v20 = vmax.f32 %v861_v37, 0.0  ;;  %1391 = vmatmul.bf16.gmra.mxu2 %v3658_v53  ;;  %1440 = vmatmul.bf16.vlgmr.msra.gmra.mxu3 %v3660_v60  ;;  %v2486_v37 = vld [vmem:[%s4412_s4 + $0xc0] sm:$0xf] }
 0x2d5   :  { %v958_v49 = vpack.c.bf16 %v926_v20, %v924_v47  ;;  %v2621_v47 = vld [vmem:[%s4412_s4 + $0xc4] sm:$0xf0]  ;;  %v2604_v20 = vld [vmem:[%s4412_s4 + $0x44] sm:$0xf] }
 0x2d6   :  { %1559 = vmatmul.bf16.gmra.mxu0 %v3604_v31  ;;  %v954_v31 = vpack.c.bf16 %v918_v19, %v916_v30  ;;  %v3739_v42 = vpop.f32.mrf.mxu2  ;;  %v2427_v62 = vor.u32 %v2604_v20, %v2424_v5  ;;  %v2494_v30 = vld [vmem:[%s4412_s4 + $0xd0] sm:$0xf] }
 0x2d7   :  { %1610 = vmatpush.bf16.msrb.mxu1 %v958_v49  ;;  %v2487_v49 = vor.u32 %v2621_v47, %v2486_v37  ;;  %v2495_v50 = vor.u32 %v2623_v18, %v2494_v30 }
 0x2d9   :  { %v3743_v57 = vpop.permute.xlu1 %1090 }
 0x2db   :  { %1611 = vmatpush.bf16.msrb.mxu1 %v956_v52 }
 0x2de   :  { %v3745_v14 = vpop.f32.mrf.mxu2 }
 0x2df   :  { %1612 = vmatpush.bf16.msrb.mxu1 %v954_v31 }
 0x2e1   :  { %v3761_v39 = vpop.permute.xlu1 %1170 }
 0x2e2   :  { %4434 = vst [vmem:[#allocation9_spill] sm:$0xff] %v3761_v39 }
 0x2e3   :  { %1396 = vmatmul.bf16.gmra.mxu2 %v2463_v44  ;;  %1445 = vmatmul.bf16.gmra.mxu3 %v2403_v35 }
 0x2e4   :  { %1613 = vmatpush.bf16.msrb.mxu1 %v952_v6  ;;  %v2608_v6 = vld [vmem:[%s4412_s4 + $0x64] sm:$0xf] }
 0x2e5   :  { %v2443_v22 = vor.u32 %v2608_v6, %v2440_v36 }
 0x2e6   :  { %1564 = vmatmul.bf16.gmra.mxu0 %v3628_v59  ;;  %v898_v59 = vmax.f32 %v826_v61, 0.0  ;;  %v3763_v45 = vpop.f32.mrf.mxu2 }
 0x2e8   :  { %1614 = vmatpush.bf16.msrb.mxu1 %v950_v51  ;;  %v944_v10 = vpack.c.bf16 %v898_v59, %v896_v55  ;;  %v3811_v51 = vpop.permute.xlu0 %1080  ;;  %v2511_v55 = vor.u32 %v2627_v16, %v2510_v29  ;;  %v2451_v59 = vor.u32 %v2610_v17, %v2448_v13 }
 0x2e9   :  { %v3767_v52 = vpop.permute.xlu1 %1155 }
 0x2ea   :  { %4435 = vst [vmem:[#allocation10_spill] sm:$0xff] %v3767_v52 }
 0x2ec   :  { %1615 = vmatpush.bf16.msrb.mxu1 %v948_v34 }
 0x2ee   :  { %v3769_v63 = vpop.f32.mrf.mxu2 }
 0x2f0   :  { %1616 = vmatpush.bf16.msrb.mxu1 %v946_v28  ;;  %v3824_v34 = vpop.permute.xlu0 %1065 }
 0x2f1   :  { %v3787_v40 = vpop.permute.xlu1 %1070 }
 0x2f3   :  { %1401 = vmatmul.bf16.gmra.mxu2 %v2471_v58  ;;  %1450 = vmatmul.bf16.gmra.mxu3 %v2411_v48  ;;  %v3785_v8 = vpop.f32.mrf.mxu0 }
 0x2f4   :  { %1617 = vmatpush.bf16.msrb.mxu1 %v944_v10 }
 0x2f6   :  { %1569 = vmatmul.bf16.gmra.mxu0 %v3658_v53  ;;  %v2419_v53 = vor.u32 %v2602_v32, %v2416_v2  ;;  %v2612_v32 = vld [vmem:[%s4412_s4 + $0x84] sm:$0xf]  ;;  %v2456_v2 = vld [vmem:[%s4412_s4 + $0x88] sm:$0xf0] }
 0x2f7   :  { %1618 = vmatmul.bf16.vlgmr.msrb.gmra.mxu1 %v3660_v60  ;;  %v3741_v60 = vpop.permute.xlu2 %1085 }
 0x2f9   :  { %v3798_v3 = vpop.permute.xlu1 %1055 }
 0x2fb   :  { %v3793_v56 = vpop.f32.mrf.mxu0 }
 0x2ff   :  { %v3750_v4 = vpop.permute.xlu2 %1165 }
 0x300   :  { %4433 = vst [vmem:[#allocation8_spill] sm:$0xff] %v3750_v4 }
 0x301   :  { %v3817_v11 = vpop.permute.xlu1 %1140 }
 0x302   :  { %4437 = vst [vmem:[#allocation12_spill] sm:$0xff] %v3817_v11 }
 0x303   :  { %1406 = vmatmul.bf16.gmra.mxu2 %v2479_v54  ;;  %1455 = vmatmul.bf16.gmra.mxu3 %v2419_v53  ;;  %v3815_v0 = vpop.f32.mrf.mxu0 }
 0x306   :  { %1574 = vmatmul.bf16.gmra.mxu0 %v2463_v44  ;;  %v3789_v44 = vpop.f32.mrf.mxu2 }
 0x307   :  { %1623 = vmatmul.bf16.gmra.mxu1 %v2403_v35  ;;  %v3765_v19 = vpop.permute.xlu2 %1075 }
 0x309   :  { %v3839_v28 = vpop.permute.xlu1 %1125 }
 0x30b   :  { %v3837_v38 = vpop.f32.mrf.mxu0 }
 0x30e   :  { %v3809_v24 = vpop.f32.mrf.mxu2 }
 0x30f   :  { %v3783_v31 = vpop.permute.xlu2 %1160 }
 0x310   :  { %4436 = vst [vmem:[#allocation11_spill] sm:$0xff] %v3783_v31 }
 0x311   :  { %v3849_v7 = vpop.permute.xlu1 %1040 }
 0x313   :  { %1411 = vmatmul.bf16.gmra.mxu2 %v2487_v49  ;;  %1460 = vmatmul.bf16.gmra.mxu3 %v2427_v62  ;;  %v3847_v23 = vpop.f32.mrf.mxu0 }
 0x316   :  { %1579 = vmatmul.bf16.gmra.mxu0 %v2471_v58  ;;  %v3819_v61 = vpop.f32.mrf.mxu2 }
 0x317   :  { %1628 = vmatmul.bf16.gmra.mxu1 %v2411_v48  ;;  %v3791_v35 = vpop.permute.xlu2 %1145  ;;  %v3843_v48 = vpop.permute.xlu0 %1150 }
 0x318   :  { %4438 = vst [vmem:[#allocation13_spill] sm:$0xff] %v3843_v48 }
 0x319   :  { %v1026_v20 = vpop.permute.xlu1 %1025 }
 0x31a   :  { %v1353_v5 = vadd.f32 %v3739_v42, %v1026_v20 }
 0x31b   :  { %v3861_v47 = vpop.f32.mrf.mxu0 }
 0x31e   :  { %v3841_v58 = vpop.f32.mrf.mxu2 }
 0x31f   :  { %v3813_v25 = vpop.permute.xlu2 %1060 }
 0x323   :  { %1416 = vmatmul.bf16.gmra.mxu2 %v2495_v50  ;;  %1465 = vmatmul.bf16.gmra.mxu3 %v2435_v26  ;;  %v3866_v46 = vpop.f32.mrf.mxu0 }
 0x326   :  { %1584 = vmatmul.bf16.gmra.mxu0 %v2479_v54  ;;  %v2459_v54 = vor.u32 %v2612_v32, %v2456_v2  ;;  %v2472_v2 = vld [vmem:[%s4412_s4 + $0xa8] sm:$0xf0] }
 0x327   :  { %1633 = vmatmul.bf16.gmra.mxu1 %v2419_v53  ;;  %v3835_v9 = vpop.permute.xlu2 %1045  ;;  %v3857_v53 = vpop.permute.xlu0 %1135 }
 0x32b   :  { %v3880_v17 = vpop.f32.mrf.mxu0 }
 0x32f   :  { %v3845_v10 = vpop.permute.xlu2 %1130  ;;  %v3864_v30 = vpop.permute.xlu0 %1050 }
 0x333   :  { %1421 = vmatmul.bf16.gmra.mxu2 %v2503_v33  ;;  %1470 = vmatmul.bf16.gmra.mxu3 %v2443_v22 }
 0x336   :  { %1589 = vmatmul.bf16.gmra.mxu0 %v2487_v49 }
 0x337   :  { %1638 = vmatmul.bf16.gmra.mxu1 %v2427_v62  ;;  %v3859_v37 = vpop.permute.xlu2 %1115  ;;  %v1036_v29 = vpop.permute.xlu0 %1035 }
 0x338   :  { %v1358_v16 = vadd.f32 %v3763_v45, %v1036_v29 }
 0x33f   :  { %v1031_v18 = vpop.permute.xlu2 %1030 }
 0x343   :  { %1426 = vmatmul.bf16.gmra.mxu2 %v2511_v55  ;;  %1475 = vmatmul.bf16.gmra.mxu3 %v2451_v59 }
 0x346   :  { %1594 = vmatmul.bf16.gmra.mxu0 %v2495_v50  ;;  %v2464_v50 = vld [vmem:[%s4412_s4 + $0x98] sm:$0xf0] }
 0x347   :  { %1643 = vmatmul.bf16.gmra.mxu1 %v2435_v26  ;;  %v1355_v26 = vadd.f32 %v3745_v14, %v1031_v18  ;;  %v2467_v43 = vor.u32 %v2614_v15, %v2464_v50  ;;  %v2616_v14 = vld [vmem:[%s4412_s4 + $0xa4] sm:$0xf] }
 0x348   :  { %v3892_v15 = vor.u32 %v2616_v14, %v2472_v2 }
 0x353   :  { %1480 = vmatmul.bf16.gmra.mxu3 %v2459_v54 }
 0x356   :  { %v1441_v49 = vpop.f32.mrf.mxu3  ;;  %1599 = vmatmul.bf16.gmra.mxu0 %v2503_v33  ;;  %v3875_v33 = vpop.f32.mrf.mxu2 }
 0x357   :  { %v1442_v62 = vadd.f32 %v1441_v49, %v1353_v5  ;;  %1648 = vmatmul.bf16.gmra.mxu1 %v2443_v22  ;;  %v1360_v5 = vadd.f32 %v3769_v63, %v3849_v7 }
 0x359   :  { %v1699_v6 = vmax.f32 %v1442_v62, 0.0 }
 0x35e   :  { %v1443_v42 = vpop.f32.mrf.mxu3  ;;  %v3890_v49 = vpop.f32.mrf.mxu2 }
 0x35f   :  { %v1444_v12 = vadd.f32 %v1443_v42, %v1355_v26 }
 0x361   :  { %v1701_v36 = vmax.f32 %v1444_v12, 0.0  ;;  %v1363_v12 = vadd.f32 %v3789_v44, %v3835_v9  ;;  %v1365_v44 = vadd.f32 %v3809_v24, %v3864_v30 }
 0x363   :  { %1485 = vmatmul.bf16.gmra.mxu3 %v2467_v43  ;;  %v3877_v22 = vpack.c.bf16 %v1701_v36, %v1699_v6 }
 0x366   :  { %v1446_v13 = vpop.f32.mrf.mxu3  ;;  %1604 = vmatmul.bf16.gmra.mxu0 %v2511_v55  ;;  %v3900_v36 = vpop.f32.mrf.mxu2 }
 0x367   :  { %v1447_v32 = vadd.f32 %v1446_v13, %v1358_v16  ;;  %1653 = vmatmul.bf16.gmra.mxu1 %v2451_v59  ;;  %v1531_v59 = vadd.f32 %v3785_v8, %v1026_v20  ;;  %v1533_v13 = vadd.f32 %v3793_v56, %v1031_v18  ;;  %v2618_v8 = vld [vmem:[%s4412_s4 + $0xb4] sm:$0xf]  ;;  %v2480_v20 = vld [vmem:[%s4412_s4 + $0xb8] sm:$0xf0] }
 0x369   :  { %v1703_v55 = vmax.f32 %v1447_v32, 0.0 }
 0x36e   :  { %v1448_v45 = vpop.f32.mrf.mxu3 }
 0x36f   :  { %v1449_v62 = vadd.f32 %v1448_v45, %v1360_v5 }
 0x371   :  { %v1705_v50 = vmax.f32 %v1449_v62, 0.0 }
 0x373   :  { %1490 = vmatmul.bf16.gmra.mxu3 %v3892_v15  ;;  %v3896_v26 = vpack.c.bf16 %v1705_v50, %v1703_v55  ;;  %v3911_v55 = vpop.f32.mrf.mxu2 }
 0x374   :  { %v1619_v42 = vpop.f32.mrf.mxu1 }
 0x375   :  { %v1620_v6 = vadd.f32 %v1619_v42, %v1531_v59  ;;  %v3915_v59 = vpop.f32.mrf.mxu0  ;;  %v1536_v42 = vadd.f32 %v3815_v0, %v1036_v29  ;;  %v2620_v0 = vld [vmem:[%s4412_s4 + $0xc4] sm:$0xf]  ;;  %v1370_v29 = vadd.f32 %v3841_v58, %v3813_v25  ;;  %v1373_v58 = vadd.f32 %v3875_v33, %v3824_v34  ;;  %v2496_v33 = vld [vmem:[%s4412_s4 + $0xd8] sm:$0xf0] }
 0x376   :  { %v1451_v63 = vpop.f32.mrf.mxu3 }
 0x377   :  { %v1452_v16 = vadd.f32 %v1451_v63, %v1363_v12  ;;  %1658 = vmatmul.bf16.gmra.mxu1 %v2459_v54  ;;  %v1700_v5 = vmax.f32 %v1620_v6, 0.0  ;;  %v2483_v54 = vor.u32 %v2618_v8, %v2480_v20  ;;  %v1368_v6 = vadd.f32 %v3819_v61, %v3798_v3  ;;  %v2488_v61 = vld [vmem:[%s4412_s4 + $0xc8] sm:$0xf0] }
 0x379   :  { %v1707_v56 = vmax.f32 %v1452_v16, 0.0  ;;  %v1538_v16 = vadd.f32 %v3837_v38, %v3849_v7 }
 0x37b   :  { %v3924_v8 = vpop.f32.mrf.mxu2 }
 0x37c   :  { %v1621_v32 = vpop.f32.mrf.mxu1 }
 0x37d   :  { %v1622_v14 = vadd.f32 %v1621_v32, %v1533_v13  ;;  %v3926_v20 = vpop.f32.mrf.mxu0 }
 0x37e   :  { %v1453_v2 = vpop.f32.mrf.mxu3 }
 0x37f   :  { %v1702_v45 = vmax.f32 %v1622_v14, 0.0  ;;  %v1454_v62 = vadd.f32 %v1453_v2, %v1365_v44 }
 0x381   :  { %v1709_v18 = vmax.f32 %v1454_v62, 0.0  ;;  %v3913_v50 = vpack.c.bf16 %v1702_v45, %v1700_v5  ;;  %v2491_v5 = vor.u32 %v2620_v0, %v2488_v61 }
 0x383   :  { %1495 = vmatmul.bf16.gmra.mxu3 %v2483_v54  ;;  %v3918_v12 = vpack.c.bf16 %v1709_v18, %v1707_v56  ;;  %v1541_v18 = vadd.f32 %v3847_v23, %v3835_v9  ;;  %v2622_v23 = vld [vmem:[%s4412_s4 + $0xd4] sm:$0xf] }
 0x384   :  { %v1624_v24 = vpop.f32.mrf.mxu1 }
 0x385   :  { %v1625_v63 = vadd.f32 %v1624_v24, %v1536_v42 }
 0x386   :  { %v1456_v13 = vpop.f32.mrf.mxu3 }
 0x387   :  { %v1457_v32 = vadd.f32 %v1456_v13, %v1368_v6  ;;  %1663 = vmatmul.bf16.gmra.mxu1 %v2467_v43  ;;  %v1704_v2 = vmax.f32 %v1625_v63, 0.0  ;;  %v1384_v6 = vpop.f32.mrf.mxu2  ;;  %v3944_v63 = vpop.f32.mrf.mxu0 }
 0x389   :  { %v1711_v45 = vmax.f32 %v1457_v32, 0.0  ;;  %v1543_v32 = vadd.f32 %v3861_v47, %v3864_v30  ;;  %v1546_v47 = vadd.f32 %v3866_v46, %v3798_v3  ;;  %v2504_v3 = vld [vmem:[%s4412_s4 + $0xe8] sm:$0xf0] }
 0x38c   :  { %v1626_v44 = vpop.f32.mrf.mxu1 }
 0x38d   :  { %v1627_v43 = vadd.f32 %v1626_v44, %v1538_v16 }
 0x38e   :  { %v1458_v14 = vpop.f32.mrf.mxu3 }
 0x38f   :  { %v1706_v38 = vmax.f32 %v1627_v43, 0.0  ;;  %v1459_v7 = vadd.f32 %v1458_v14, %v1370_v29  ;;  %v1387_v29 = vpop.f32.mrf.mxu2 }
 0x391   :  { %v1713_v62 = vmax.f32 %v1459_v7, 0.0  ;;  %v3936_v56 = vpack.c.bf16 %v1706_v38, %v1704_v2  ;;  %v2499_v2 = vor.u32 %v2622_v23, %v2496_v33  ;;  %v1551_v33 = vadd.f32 %v3915_v59, %v3824_v34 }
 0x393   :  { %1500 = vmatmul.bf16.gmra.mxu3 %v2491_v5  ;;  %v3940_v42 = vpack.c.bf16 %v1713_v62, %v1711_v45 }
 0x394   :  { %v1629_v24 = vpop.f32.mrf.mxu1 }
 0x395   :  { %v1630_v13 = vadd.f32 %v1629_v24, %v1541_v18  ;;  %v1548_v24 = vadd.f32 %v3880_v17, %v3813_v25 }
 0x396   :  { %v1461_v16 = vpop.f32.mrf.mxu3 }
 0x397   :  { %v3946_v44 = vadd.f32 %v1461_v16, %v1373_v58  ;;  %1668 = vmatmul.bf16.gmra.mxu1 %v3892_v15  ;;  %v1708_v43 = vmax.f32 %v1630_v13, 0.0  ;;  %v3959_v15 = vpop.f32.mrf.mxu0  ;;  %v1389_v62 = vpop.f32.mrf.mxu2  ;;  %v2624_v13 = vld [vmem:[%s4412_s4 + $0xe4] sm:$0xf] }
 0x39c   :  { %v1631_v9 = vpop.f32.mrf.mxu1 }
 0x39d   :  { %v1632_v0 = vadd.f32 %v1631_v9, %v1543_v32 }
 0x39e   :  { %v3957_v61 = vpop.f32.mrf.mxu3 }
 0x39f   :  { %v1710_v14 = vmax.f32 %v1632_v0, 0.0  ;;  %v3965_v18 = vpop.f32.mrf.mxu0  ;;  %v1392_v25 = vpop.f32.mrf.mxu2 }
 0x3a1   :  { %v3961_v38 = vpack.c.bf16 %v1710_v14, %v1708_v43 }
 0x3a3   :  { %1505 = vmatmul.bf16.gmra.mxu3 %v2499_v2 }
 0x3a4   :  { %v1634_v30 = vpop.f32.mrf.mxu1 }
 0x3a5   :  { %v1635_v7 = vadd.f32 %v1634_v30, %v1546_v47  ;;  %v2626_v30 = vld [vmem:[%s4412_s4 + $0xf4] sm:$0xf] }
 0x3a6   :  { %v1466_v45 = vpop.f32.mrf.mxu3 }
 0x3a7   :  { %1673 = vmatmul.bf16.gmra.mxu1 %v2483_v54  ;;  %v1712_v32 = vmax.f32 %v1635_v7, 0.0  ;;  %v2507_v54 = vor.u32 %v2624_v13, %v2504_v3  ;;  %v3979_v17 = vpop.f32.mrf.mxu0  ;;  %v2512_v7 = vld [vmem:[%s4412_s4 + $0xf8] sm:$0xf0]  ;;  %v3991_v34 = vpop.f32.mrf.mxu2 }
 0x3a8   :  { %4439 = vst [vmem:[#allocation14_spill] sm:$0xff] %v3991_v34  ;;  %v1390_v34 = vadd.f32 %v1389_v62, %v3719_v27 }
 0x3ac   :  { %v1636_v58 = vpop.f32.mrf.mxu1 }
 0x3ad   :  { %v1637_v46 = vadd.f32 %v1636_v58, %v1548_v24  ;;  %v2515_v58 = vor.u32 %v2626_v30, %v2512_v7  ;;  %v1383_v30 = vadd.f32 %v3924_v8, %v3741_v60 }
 0x3ae   :  { %v1468_v16 = vpop.f32.mrf.mxu3 }
 0x3af   :  { %v1714_v9 = vmax.f32 %v1637_v46, 0.0  ;;  %v1565_v59 = vpop.f32.mrf.mxu0 }
 0x3b1   :  { %v3975_v23 = vpack.c.bf16 %v1714_v9, %v1712_v32  ;;  %v3995_v32 = vpop.permute.xlu0 %1120  ;;  %v1388_v9 = vadd.f32 %v1387_v29, %v3717_v41 }
 0x3b3   :  { %1510 = vmatmul.bf16.gmra.mxu3 %v2507_v54 }
 0x3b4   :  { %v1639_v0 = vpop.f32.mrf.mxu1 }
 0x3b5   :  { %v3981_v43 = vadd.f32 %v1639_v0, %v1551_v33  ;;  %v1385_v0 = vadd.f32 %v1384_v6, %v3743_v57  ;;  %v1378_v6 = vadd.f32 %v3900_v36, %v3765_v19 }
 0x3b6   :  { %v1471_v14 = vpop.f32.mrf.mxu3 }
 0x3b7   :  { %1678 = vmatmul.bf16.gmra.mxu1 %v2491_v5  ;;  %v1397_v5 = vpop.f32.mrf.mxu2  ;;  %v1567_v46 = vpop.f32.mrf.mxu0  ;;  %v1472_v1 = vadd.f32 %v1471_v14, %v1383_v30 }
 0x3b9   :  { %v1106_v11 = vpop.permute.xlu0 %1105 }
 0x3bc   :  { %v3983_v47 = vpop.f32.mrf.mxu1 }
 0x3be   :  { %v1473_v24 = vpop.f32.mrf.mxu3 }
 0x3bf   :  { %v1474_v7 = vadd.f32 %v1473_v24, %v1385_v0  ;;  %v4006_v4 = vpop.f32.mrf.mxu2  ;;  %v4008_v21 = vpop.f32.mrf.mxu0  ;;  %v1723_v24 = vmax.f32 %v1472_v1, 0.0 }
 0x3c3   :  { %1515 = vmatmul.bf16.gmra.mxu3 %v2515_v58 }
 0x3c4   :  { %v3993_v13 = vpop.f32.mrf.mxu1 }
 0x3c6   :  { %v1476_v3 = vpop.f32.mrf.mxu3 }
 0x3c7   :  { %1683 = vmatmul.bf16.gmra.mxu1 %v2499_v2  ;;  %v1477_v48 = vadd.f32 %v1476_v3, %v1388_v9  ;;  %v1380_v2 = vadd.f32 %v3911_v55, %v3811_v51  ;;  %v1725_v3 = vmax.f32 %v1474_v7, 0.0  ;;  %v1467_v55 = vadd.f32 %v1466_v45, %v1378_v6 }
 0x3c9   :  { %v1727_v29 = vmax.f32 %v1477_v48, 0.0  ;;  %v1469_v62 = vadd.f32 %v1468_v16, %v1380_v2  ;;  %v1775_v36 = vpack.c.bf16 %v1725_v3, %v1723_v24  ;;  %v1719_v16 = vmax.f32 %v1467_v55, 0.0  ;;  %v1572_v2 = vpop.f32.mrf.mxu0 }
 0x3cb   :  { %v1721_v48 = vmax.f32 %v1469_v62, 0.0 }
 0x3cc   :  { %v3998_v33 = vpop.f32.mrf.mxu1 }
 0x3cd   :  { %v1773_v7 = vpack.c.bf16 %v1721_v48, %v1719_v16 }
 0x3ce   :  { %v1478_v52 = vpop.f32.mrf.mxu3 }
 0x3cf   :  { %v1479_v31 = vadd.f32 %v1478_v52, %v1390_v34  ;;  %v1375_v52 = vadd.f32 %v3890_v49, %v3787_v40  ;;  %v1393_v34 = vadd.f32 %v1392_v25, %v1106_v11  ;;  %v1715_v49 = vmax.f32 %v3946_v44, 0.0 }
 0x3d0   :  { %v1398_v25 = vadd.f32 %v1397_v5, %v3859_v37  ;;  %v1566_v44 = vadd.f32 %v1565_v59, %v3717_v41  ;;  %v2518_v41 = vld [vmem:[%s4414_s6] sm:$0xf] }
 0x3d1   :  { %v1729_v39 = vmax.f32 %v1479_v31, 0.0  ;;  %v1464_v31 = vadd.f32 %v3957_v61, %v1375_v52  ;;  %v1568_v52 = vadd.f32 %v1567_v46, %v3719_v27  ;;  %v1558_v27 = vadd.f32 %v3959_v15, %v3811_v51 }
 0x3d2   :  { %v1571_v51 = vadd.f32 %v4008_v21, %v1106_v11 }
 0x3d3   :  { %v1777_v9 = vpack.c.bf16 %v1729_v39, %v1727_v29  ;;  %v1402_v39 = vpop.f32.mrf.mxu2  ;;  %v1717_v30 = vmax.f32 %v1464_v31, 0.0 }
 0x3d4   :  { %v1649_v8 = vpop.f32.mrf.mxu1  ;;  %v1403_v16 = vadd.f32 %v1402_v39, %v3839_v28 }
 0x3d5   :  { %1987 = vmatpush.bf16.msrb.mxu2 %v1777_v9  ;;  %v1771_v45 = vpack.c.bf16 %v1717_v30, %v1715_v49  ;;  %v1563_v9 = vadd.f32 %v3979_v17, %v3743_v57 }
 0x3d6   :  { %v1481_v14 = vpop.f32.mrf.mxu3 }
 0x3d7   :  { %v4015_v0 = vadd.f32 %v1481_v14, %v1393_v34  ;;  %1688 = vmatmul.bf16.gmra.mxu1 %v2507_v54  ;;  %v4024_v54 = vpop.f32.mrf.mxu0  ;;  %v1647_v14 = vadd.f32 %v3998_v33, %v1558_v27 }
 0x3d9   :  { %1988 = vmatpush.bf16.msrb.mxu2 %v1775_v36  ;;  %v1553_v36 = vadd.f32 %v3926_v20, %v3787_v40  ;;  %v4063_v20 = vpop.permute.xlu1 %1110 }
 0x3da   :  { %v1573_v39 = vadd.f32 %v1572_v2, %v4063_v20 }
 0x3db   :  { %v4021_v6 = vpop.f32.mrf.mxu2 }
 0x3dc   :  { %v1651_v29 = vpop.f32.mrf.mxu1 }
 0x3dd   :  { %1989 = vmatpush.bf16.msrb.mxu2 %v1773_v7  ;;  %v1652_v55 = vadd.f32 %v1651_v29, %v1563_v9 }
 0x3de   :  { %v4018_v1 = vpop.f32.mrf.mxu3 }
 0x3df   :  { %v1726_v31 = vmax.f32 %v1652_v55, 0.0 }
 0x3e1   :  { %1990 = vmatpush.bf16.msrb.mxu2 %v1771_v45  ;;  %v1716_v45 = vmax.f32 %v3981_v43, 0.0 }
 0x3e3   :  { %v1407_v17 = vpop.f32.mrf.mxu2 }
 0x3e4   :  { %v1654_v61 = vpop.f32.mrf.mxu1 }
 0x3e5   :  { %1991 = vmatpush.bf16.msrb.mxu2 %v3940_v42  ;;  %v1655_v5 = vadd.f32 %v1654_v61, %v1566_v44  ;;  %v1561_v42 = vadd.f32 %v3965_v18, %v3741_v60  ;;  %v2631_v44 = vld [vmem:[%s4414_s6 + $0x14] sm:$0xf0] }
 0x3e6   :  { %v1486_v62 = vpop.f32.mrf.mxu3 }
 0x3e7   :  { %v4026_v3 = vadd.f32 %v1486_v62, %v1398_v25  ;;  %1693 = vmatmul.bf16.gmra.mxu1 %v2515_v58  ;;  %v1650_v59 = vadd.f32 %v1649_v8, %v1561_v42  ;;  %v1728_v60 = vmax.f32 %v1655_v5, 0.0  ;;  %v1577_v58 = vpop.f32.mrf.mxu0  ;;  %v2526_v62 = vld [vmem:[%s4414_s6 + $0x10] sm:$0xf] }
 0x3e8   :  { %v4075_v2 = vor.u32 %v2631_v44, %v2526_v62  ;;  %v4443_v44 = vld [vmem:[#allocation12_spill] sm:$0xff] }
 0x3e9   :  { %1992 = vmatpush.bf16.msrb.mxu2 %v3918_v12  ;;  %v2629_v12 = vld [vmem:[%s4414_s6 + $0x4] sm:$0xf0]  ;;  %v1724_v8 = vmax.f32 %v1650_v59, 0.0 }
 0x3ea   :  { %v4046_v46 = vor.u32 %v2629_v12, %v2518_v41  ;;  %v1408_v41 = vadd.f32 %v1407_v17, %v3857_v53  ;;  %v2633_v17 = vld [vmem:[%s4414_s6 + $0x24] sm:$0xf0] }
 0x3eb   :  { %v1776_v33 = vpack.c.bf16 %v1726_v31, %v1724_v8  ;;  %v4061_v21 = vpop.f32.mrf.mxu2 }
 0x3ec   :  { %v1656_v34 = vpop.f32.mrf.mxu1 }
 0x3ed   :  { %v1657_v24 = vadd.f32 %v1656_v34, %v1568_v52  ;;  %1993 = vmatpush.bf16.msrb.mxu2 %v3896_v26  ;;  %v1556_v26 = vadd.f32 %v3944_v63, %v3765_v19  ;;  %v1642_v19 = vadd.f32 %v3983_v47, %v1553_v36  ;;  %v1722_v63 = vmax.f32 %v1647_v14, 0.0 }
 0x3ee   :  { %v4042_v57 = vpop.f32.mrf.mxu3  ;;  %v1576_v34 = vadd.f32 %v4024_v54, %v3859_v37 }
 0x3ef   :  { %v1730_v18 = vmax.f32 %v1657_v24, 0.0  ;;  %v1645_v15 = vadd.f32 %v3993_v13, %v1556_v26  ;;  %v1718_v40 = vmax.f32 %v1642_v19, 0.0  ;;  %v1580_v13 = vpop.f32.mrf.mxu0 }
 0x3f1   :  { %v1778_v48 = vpack.c.bf16 %v1730_v18, %v1728_v60  ;;  %1994 = vmatpush.bf16.msrb.mxu2 %v3877_v22  ;;  %v1720_v29 = vmax.f32 %v1645_v15, 0.0  ;;  %v1772_v25 = vpack.c.bf16 %v1718_v40, %v1716_v45  ;;  %v1578_v60 = vadd.f32 %v1577_v58, %v3995_v32  ;;  %v2534_v18 = vld [vmem:[%s4414_s6 + $0x20] sm:$0xf] }
 0x3f3   :  { %v1774_v11 = vpack.c.bf16 %v1722_v63, %v1720_v29  ;;  %v1412_v42 = vpop.f32.mrf.mxu2 }
 0x3f4   :  { %v1659_v30 = vpop.f32.mrf.mxu1  ;;  %1995 = vmatmul.bf16.vlgmr.msrb.gmra.mxu2 %v4046_v46 }
 0x3f5   :  { %2085 = vmatpush.bf16.msra.mxu2 %v1778_v48  ;;  %v1660_v7 = vadd.f32 %v1659_v30, %v1571_v51  ;;  %v1581_v48 = vadd.f32 %v1580_v13, %v3839_v28  ;;  %v1413_v51 = vadd.f32 %v1412_v42, %v3791_v35  ;;  %v2542_v28 = vld [vmem:[%s4414_s6 + $0x30] sm:$0xf] }
 0x3f6   :  { %v1491_v22 = vpop.f32.mrf.mxu3 }
 0x3f7   :  { %v4059_v49 = vadd.f32 %v1491_v22, %v1403_v16  ;;  %v1732_v52 = vmax.f32 %v1660_v7, 0.0  ;;  %v1582_v55 = vpop.f32.mrf.mxu0  ;;  %v2635_v7 = vld [vmem:[%s4414_s6 + $0x34] sm:$0xf0] }
 0x3f9   :  { %2086 = vmatpush.bf16.msra.mxu2 %v1776_v33 }
 0x3fb   :  { %v4089_v54 = vpop.f32.mrf.mxu2 }
 0x3fc   :  { %v1661_v47 = vpop.f32.mrf.mxu1 }
 0x3fd   :  { %2087 = vmatpush.bf16.msra.mxu2 %v1774_v11  ;;  %v1662_v61 = vadd.f32 %v1661_v47, %v1573_v39  ;;  %v4120_v11 = vor.u32 %v2635_v7, %v2542_v28  ;;  %v4446_v7 = vld [vmem:[#allocation6_spill] sm:$0xff] }
 0x3fe   :  { %v4073_v9 = vpop.f32.mrf.mxu3 }
 0x3ff   :  { %v1734_v5 = vmax.f32 %v1662_v61, 0.0  ;;  %v1585_v26 = vpop.f32.mrf.mxu0  ;;  %4442 = vst [vmem:[#allocation17_spill] sm:$0xff] %v4120_v11 }
 0x400   :  { %v1586_v47 = vadd.f32 %v1585_v26, %v3857_v53  ;;  %v2637_v53 = vld [vmem:[%s4414_s6 + $0x44] sm:$0xf0] }
 0x401   :  { %2088 = vmatpush.bf16.msra.mxu2 %v1772_v25  ;;  %v4077_v43 = vpack.c.bf16 %v1734_v5, %v1732_v52 }
 0x403   :  { %4440 = vst [vmem:[#allocation15_spill] sm:$0xff] %v4077_v43  ;;  %v4107_v16 = vpop.f32.mrf.mxu2 }
 0x404   :  { %v1664_v24 = vpop.f32.mrf.mxu1  ;;  %2000 = vmatmul.bf16.gmra.mxu2 %v4075_v2 }
 0x405   :  { %2089 = vmatpush.bf16.msra.mxu2 %v3975_v23  ;;  %v1665_v12 = vadd.f32 %v1664_v24, %v1576_v34  ;;  %v2550_v24 = vld [vmem:[%s4414_s6 + $0x40] sm:$0xf] }
 0x406   :  { %v1496_v27 = vpop.f32.mrf.mxu3 }
 0x407   :  { %v4084_v59 = vadd.f32 %v1496_v27, %v1408_v41  ;;  %v1587_v19 = vpop.f32.mrf.mxu0 }
 0x408   :  { %v1588_v52 = vadd.f32 %v1587_v19, %v4443_v44 }
 0x409   :  { %2090 = vmatpush.bf16.msra.mxu2 %v3961_v38  ;;  %v1736_v38 = vmax.f32 %v1665_v12, 0.0 }
 0x40b   :  { %v1419_v13 = vpop.f32.mrf.mxu2 }
 0x40c   :  { %v1666_v37 = vpop.f32.mrf.mxu1 }
 0x40d   :  { %2091 = vmatpush.bf16.msra.mxu2 %v3936_v56  ;;  %v1667_v23 = vadd.f32 %v1666_v37, %v1578_v60  ;;  %v4100_v56 = vor.u32 %v2633_v17, %v2534_v18  ;;  %v4135_v60 = vor.u32 %v2637_v53, %v2550_v24  ;;  %v4449_v53 = vld [vmem:[#allocation8_spill] sm:$0xff] }
 0x40e   :  { %v4097_v14 = vpop.f32.mrf.mxu3 }
 0x40f   :  { %v1738_v31 = vmax.f32 %v1667_v23, 0.0  ;;  %4441 = vst [vmem:[#allocation16_spill] sm:$0xff] %v4100_v56  ;;  %v1590_v45 = vpop.f32.mrf.mxu0 }
 0x410   :  { %4444 = vst [vmem:[#allocation12_spill] sm:$0xff] %v4135_v60  ;;  %v1591_v23 = vadd.f32 %v1590_v45, %v3791_v35  ;;  %v4447_v45 = vld [vmem:[#allocation9_spill] sm:$0xff] }
 0x411   :  { %2092 = vmatpush.bf16.msra.mxu2 %v3913_v50  ;;  %v4102_v58 = vpack.c.bf16 %v1738_v31, %v1736_v38  ;;  %v1583_v50 = vadd.f32 %v1582_v55, %v3845_v10 }
 0x413   :  { %v1422_v5 = vpop.f32.mrf.mxu2 }
 0x414   :  { %v1669_v36 = vpop.f32.mrf.mxu1  ;;  %2005 = vmatmul.bf16.gmra.mxu2 %v4100_v56 }
 0x415   :  { %v1670_v15 = vadd.f32 %v1669_v36, %v1581_v48  ;;  %v2558_v36 = vld [vmem:[%s4414_s6 + $0x50] sm:$0xf] }
 0x416   :  { %v1501_v8 = vpop.f32.mrf.mxu3 }
 0x417   :  { %v4109_v30 = vadd.f32 %v1501_v8, %v1413_v51  ;;  %v1740_v29 = vmax.f32 %v1670_v15, 0.0  ;;  %v4127_v34 = vpop.f32.mrf.mxu0  ;;  %v2639_v51 = vld [vmem:[%s4414_s6 + $0x54] sm:$0xf0] }
 0x418   :  { %v4155_v19 = vor.u32 %v2639_v51, %v2558_v36  ;;  %v4450_v36 = vld [vmem:[#allocation11_spill] sm:$0xff] }
 0x41a   :  { %4445 = vst [vmem:[#allocation18_spill] sm:$0xff] %v4155_v19 }
 0x41b   :  { %v1424_v17 = vpop.f32.mrf.mxu2 }
 0x41c   :  { %v1671_v63 = vpop.f32.mrf.mxu1 }
 0x41d   :  { %v1672_v33 = vadd.f32 %v1671_v63, %v1583_v50 }
 0x41e   :  { %v4118_v22 = vpop.f32.mrf.mxu3 }
 0x41f   :  { %v1742_v40 = vmax.f32 %v1672_v33, 0.0  ;;  %v4143_v38 = vpop.f32.mrf.mxu0 }
 0x421   :  { %v4122_v39 = vpack.c.bf16 %v1742_v40, %v1740_v29 }
 0x423   :  { %v1427_v15 = vpop.f32.mrf.mxu2 }
 0x424   :  { %v1674_v61 = vpop.f32.mrf.mxu1  ;;  %2010 = vmatmul.bf16.gmra.mxu2 %v4120_v11  ;;  %v1428_v29 = vadd.f32 %v1427_v15, %v4446_v7 }
 0x425   :  { %v1675_v25 = vadd.f32 %v1674_v61, %v1586_v47  ;;  %v1425_v47 = vadd.f32 %v1424_v17, %v4447_v45  ;;  %v4448_v61 = vld [vmem:[#allocation7_spill] sm:$0xff]  ;;  %v1420_v17 = vadd.f32 %v1419_v13, %v4450_v36 }
 0x426   :  { %v1506_v62 = vpop.f32.mrf.mxu3 }
 0x427   :  { %v1744_v12 = vmax.f32 %v1675_v25, 0.0  ;;  %v4153_v8 = vpop.f32.mrf.mxu0 }
 0x42b   :  { %v1429_v33 = vpop.f32.mrf.mxu2 }
 0x42c   :  { %v1676_v42 = vpop.f32.mrf.mxu1  ;;  %v1430_v25 = vadd.f32 %v1429_v33, %v4448_v61  ;;  %v4451_v33 = vld [vmem:[#allocation10_spill] sm:$0xff] }
 0x42d   :  { %v1677_v55 = vadd.f32 %v1676_v42, %v1588_v52  ;;  %v2566_v42 = vld [vmem:[%s4414_s6 + $0x60] sm:$0xf] }
 0x42e   :  { %v1508_v41 = vpop.f32.mrf.mxu3 }
 0x42f   :  { %v1746_v27 = vmax.f32 %v1677_v55, 0.0  ;;  %v4160_v28 = vpop.f32.mrf.mxu0  ;;  %v2641_v55 = vld [vmem:[%s4414_s6 + $0x64] sm:$0xf0] }
 0x431   :  { %v4137_v37 = vpack.c.bf16 %v1746_v27, %v1744_v12  ;;  %v1423_v12 = vadd.f32 %v1422_v5, %v4449_v53  ;;  %v4452_v5 = vld [vmem:[#allocation13_spill] sm:$0xff] }
 0x434   :  { %v1679_v18 = vpop.f32.mrf.mxu1  ;;  %2015 = vmatmul.bf16.gmra.mxu2 %v4135_v60 }
 0x435   :  { %v4141_v26 = vadd.f32 %v1679_v18, %v1591_v23  ;;  %v4174_v18 = vor.u32 %v2641_v55, %v2566_v42 }
 0x436   :  { %v1511_v31 = vpop.f32.mrf.mxu3 }
 0x437   :  { %v1512_v51 = vadd.f32 %v1511_v31, %v1423_v12  ;;  %v1602_v56 = vpop.f32.mrf.mxu0 }
 0x43c   :  { %v4145_v48 = vpop.f32.mrf.mxu1 }
 0x43e   :  { %v1513_v35 = vpop.f32.mrf.mxu3 }
 0x43f   :  { %v1514_v27 = vadd.f32 %v1513_v35, %v1425_v47  ;;  %v1415_v35 = vadd.f32 %v4089_v54, %v4452_v5  ;;  %v1405_v54 = vadd.f32 %v4021_v6, %v3845_v10  ;;  %v1400_v10 = vadd.f32 %v4006_v4, %v3995_v32 }
 0x440   :  { %v1743_v6 = vmax.f32 %v4084_v59, 0.0 }
 0x441   :  { %v1757_v60 = vmax.f32 %v1514_v27, 0.0  ;;  %v1504_v13 = vadd.f32 %v4118_v22, %v1415_v35  ;;  %v2574_v22 = vld [vmem:[%s4414_s6 + $0x70] sm:$0xf]  ;;  %v1603_v35 = vadd.f32 %v1602_v56, %v4447_v45  ;;  %v2520_v56 = vld [vmem:[%s4414_s6 + $0x8] sm:$0xf0] }
 0x443   :  { %v1749_v55 = vmax.f32 %v1504_v13, 0.0 }
 0x444   :  { %v4157_v50 = vpop.f32.mrf.mxu1  ;;  %2020 = vmatmul.bf16.gmra.mxu2 %v4155_v19  ;;  %v1509_v19 = vadd.f32 %v1508_v41, %v1420_v17 }
 0x446   :  { %v1516_v63 = vpop.f32.mrf.mxu3  ;;  %v1753_v31 = vmax.f32 %v1509_v19, 0.0 }
 0x447   :  { %v1517_v52 = vadd.f32 %v1516_v63, %v1428_v29  ;;  %v1418_v29 = vadd.f32 %v4107_v16, %v4451_v33  ;;  %v1410_v16 = vadd.f32 %v4061_v21, %v4443_v44  ;;  %v2643_v21 = vld [vmem:[%s4414_s6 + $0x74] sm:$0xf0] }
 0x448   :  { %v4196_v19 = vor.u32 %v2643_v21, %v2574_v22  ;;  %v1748_v22 = vmax.f32 %v4141_v26, 0.0  ;;  %v2632_v26 = vld [vmem:[%s4414_s6 + $0x24] sm:$0xf]  ;;  %v4454_v21 = vld [vmem:[#allocation15_spill] sm:$0xff] }
 0x449   :  { %v1759_v15 = vmax.f32 %v1517_v52, 0.0  ;;  %v1507_v47 = vadd.f32 %v1506_v62, %v1418_v29  ;;  %v1499_v42 = vadd.f32 %v4097_v14, %v1410_v16  ;;  %v1747_v62 = vmax.f32 %v4109_v30, 0.0 }
 0x44a   :  { %v1494_v14 = vadd.f32 %v4073_v9, %v1405_v54  ;;  %v1489_v30 = vadd.f32 %v4042_v57, %v1400_v10  ;;  %v1735_v57 = vmax.f32 %v4026_v3, 0.0  ;;  %v2628_v3 = vld [vmem:[%s4414_s6 + $0x4] sm:$0xf] }
 0x44b   :  { %v1751_v41 = vmax.f32 %v1507_v47, 0.0  ;;  %v1745_v44 = vmax.f32 %v1499_v42, 0.0  ;;  %v2636_v10 = vld [vmem:[%s4414_s6 + $0x44] sm:$0xf] }
 0x44c   :  { %v4163_v40 = vpop.f32.mrf.mxu1  ;;  %v1741_v27 = vmax.f32 %v1494_v14, 0.0  ;;  %v1737_v29 = vmax.f32 %v1489_v30, 0.0 }
 0x44e   :  { %v1518_v24 = vpop.f32.mrf.mxu3 }
 0x44f   :  { %v1519_v23 = vadd.f32 %v1518_v24, %v1430_v25  ;;  %v1755_v25 = vmax.f32 %v1512_v51, 0.0  ;;  %v1789_v24 = vpack.c.bf16 %v1753_v31, %v1751_v41  ;;  %v4453_v51 = vld [vmem:[#allocation14_spill] sm:$0xff] }
 0x450   :  { %v1395_v9 = vadd.f32 %v4453_v51, %v4063_v20  ;;  %v1781_v20 = vpack.c.bf16 %v1737_v29, %v1735_v57  ;;  %v2638_v51 = vld [vmem:[%s4414_s6 + $0x54] sm:$0xf]  ;;  %v2568_v57 = vld [vmem:[%s4414_s6 + $0x68] sm:$0xf0] }
 0x451   :  { %v1761_v63 = vmax.f32 %v1519_v23, 0.0  ;;  %v1791_v52 = vpack.c.bf16 %v1757_v60, %v1755_v25  ;;  %v1787_v60 = vpack.c.bf16 %v1749_v55, %v1747_v62  ;;  %v1785_v23 = vpack.c.bf16 %v1745_v44, %v1743_v6  ;;  %v4456_v44 = vld [vmem:[#allocation17_spill] sm:$0xff]  ;;  %v2552_v6 = vld [vmem:[%s4414_s6 + $0x48] sm:$0xf0] }
 0x452   :  { %v4274_v30 = vor.u32 %v2636_v10, %v2552_v6 }
 0x453   :  { %v1793_v11 = vpack.c.bf16 %v1761_v63, %v1759_v15  ;;  %v1739_v15 = vmax.f32 %v4059_v49, 0.0  ;;  %v1484_v63 = vadd.f32 %v4018_v1, %v1395_v9  ;;  %v1601_v49 = vadd.f32 %v4160_v28, %v4449_v53  ;;  %v2560_v9 = vld [vmem:[%s4414_s6 + $0x58] sm:$0xf0] }
 0x454   :  { %v1689_v43 = vpop.f32.mrf.mxu1  ;;  %2025 = vmatmul.bf16.gmra.mxu2 %v4174_v18  ;;  %v1731_v1 = vmax.f32 %v4015_v0, 0.0  ;;  %v4222_v53 = vor.u32 %v2628_v3, %v2520_v56  ;;  %v1596_v0 = vadd.f32 %v4143_v38, %v4451_v33  ;;  %v4320_v3 = vpop.permute.xlu0 %1904 }
 0x455   :  { %2036 = vmatpush.bf16.msrb.mxu3 %v1793_v11  ;;  %v1605_v11 = vpop.f32.mrf.mxu0  ;;  %v1783_v4 = vpack.c.bf16 %v1741_v27, %v1739_v15  ;;  %v1733_v47 = vmax.f32 %v1484_v63, 0.0  ;;  %v1690_v45 = vadd.f32 %v1689_v43, %v1601_v49  ;;  %v4284_v15 = vor.u32 %v2638_v51, %v2560_v9  ;;  %v4458_v63 = vld [vmem:[#allocation18_spill] sm:$0xff]  ;;  %v2576_v49 = vld [vmem:[%s4414_s6 + $0x78] sm:$0xf0] }
 0x456   :  { %v1606_v59 = vadd.f32 %v1605_v11, %v4446_v7  ;;  %v1598_v7 = vadd.f32 %v4153_v8, %v4450_v36  ;;  %v1685_v54 = vadd.f32 %v4157_v50, %v1596_v0  ;;  %v2630_v50 = vld [vmem:[%s4414_s6 + $0x14] sm:$0xf] }
 0x457   :  { %v1779_v28 = vpack.c.bf16 %v1733_v47, %v1731_v1  ;;  %v1756_v8 = vmax.f32 %v1690_v45, 0.0 }
 0x458   :  { %v1687_v42 = vadd.f32 %v4163_v40, %v1598_v7  ;;  %v1752_v33 = vmax.f32 %v1685_v54, 0.0 }
 0x459   :  { %2037 = vmatpush.bf16.msrb.mxu3 %v1791_v52 }
 0x45a   :  { %v1754_v36 = vmax.f32 %v1687_v42, 0.0 }
 0x45c   :  { %v1691_v12 = vpop.f32.mrf.mxu1  ;;  %v1790_v62 = vpack.c.bf16 %v1754_v36, %v1752_v33  ;;  %v4326_v45 = vpop.permute.xlu0 %1879 }
 0x45d   :  { %2038 = vmatpush.bf16.msrb.mxu3 %v1789_v24  ;;  %v1607_v32 = vpop.f32.mrf.mxu0  ;;  %v1692_v52 = vadd.f32 %v1691_v12, %v1603_v35  ;;  %v1593_v12 = vadd.f32 %v4127_v34, %v4452_v5  ;;  %v2536_v5 = vld [vmem:[%s4414_s6 + $0x28] sm:$0xf0] }
 0x45e   :  { %v1608_v25 = vadd.f32 %v1607_v32, %v4448_v61  ;;  %v4254_v11 = vor.u32 %v2632_v26, %v2536_v5  ;;  %v4290_v32 = vpop.permute.xlu1 %1889 }
 0x45f   :  { %v1758_v55 = vmax.f32 %v1692_v52, 0.0  ;;  %v1682_v43 = vadd.f32 %v4145_v48, %v1593_v12 }
 0x461   :  { %2039 = vmatpush.bf16.msrb.mxu3 %v1787_v60  ;;  %v1792_v38 = vpack.c.bf16 %v1758_v55, %v1756_v8  ;;  %v1750_v40 = vmax.f32 %v1682_v43, 0.0 }
 0x463   :  { %v1788_v34 = vpack.c.bf16 %v1750_v40, %v1748_v22 }
 0x464   :  { %v1694_v17 = vpop.f32.mrf.mxu1  ;;  %2030 = vmatmul.bf16.gmra.mxu2 %v4196_v19  ;;  %v4334_v55 = vpop.permute.xlu0 %1874 }
 0x465   :  { %2040 = vmatpush.bf16.msrb.mxu3 %v1785_v23  ;;  %v1695_v13 = vadd.f32 %v1694_v17, %v1606_v59  ;;  %v4457_v23 = vld [vmem:[#allocation12_spill] sm:$0xff]  ;;  %v2640_v59 = vld [vmem:[%s4414_s6 + $0x64] sm:$0xf] }
 0x466   :  { %v4298_v47 = vor.u32 %v2640_v59, %v2568_v57 }
 0x467   :  { %v1760_v61 = vmax.f32 %v1695_v13, 0.0  ;;  %v4304_v13 = vpop.permute.xlu1 %1884 }
 0x469   :  { %2041 = vmatpush.bf16.msrb.mxu3 %v1783_v4  ;;  %v4288_v4 = vpop.permute.xlu2 %1899 }
 0x46c   :  { %v1696_v31 = vpop.f32.mrf.mxu1  ;;  %v4339_v36 = vpop.permute.xlu0 %1849 }
 0x46d   :  { %v1697_v16 = vadd.f32 %v1696_v31, %v1608_v25  ;;  %2042 = vmatpush.bf16.msrb.mxu3 %v1781_v20  ;;  %v2642_v31 = vld [vmem:[%s4414_s6 + $0x74] sm:$0xf] }
 0x46e   :  { %v4314_v52 = vor.u32 %v2642_v31, %v2576_v49 }
 0x46f   :  { %v1762_v41 = vmax.f32 %v1697_v16, 0.0  ;;  %v4316_v16 = vpop.permute.xlu1 %1859 }
 0x471   :  { %v1794_v24 = vpack.c.bf16 %v1762_v41, %v1760_v61  ;;  %2043 = vmatpush.bf16.msrb.mxu3 %v1779_v28  ;;  %v4302_v25 = vpop.permute.xlu2 %1894 }
 0x474   :  { %2044 = vmatmul.bf16.vlgmr.msrb.gmra.mxu3 %v4222_v53  ;;  %2093 = vmatmul.bf16.vlgmr.msra.gmra.mxu2 %v4046_v46  ;;  %v2528_v46 = vld [vmem:[%s4414_s6 + $0x18] sm:$0xf0]  ;;  %v4345_v22 = vpop.permute.xlu0 %1844 }
 0x475   :  { %2134 = vmatpush.bf16.msra.mxu3 %v1794_v24  ;;  %v4240_v48 = vor.u32 %v2630_v50, %v2528_v46 }
 0x477   :  { %v4324_v7 = vpop.permute.xlu1 %1854 }
 0x479   :  { %2135 = vmatpush.bf16.msra.mxu3 %v1792_v38  ;;  %v4312_v1 = vpop.permute.xlu2 %1869 }
 0x47d   :  { %2136 = vmatpush.bf16.msra.mxu3 %v1790_v62 }
 0x47f   :  { %v4331_v41 = vpop.permute.xlu1 %1829 }
 0x481   :  { %2137 = vmatpush.bf16.msra.mxu3 %v1788_v34  ;;  %v4322_v56 = vpop.permute.xlu2 %1864 }
 0x484   :  { %2049 = vmatmul.bf16.gmra.mxu3 %v4240_v48  ;;  %2098 = vmatmul.bf16.gmra.mxu2 %v4075_v2  ;;  %v2634_v2 = vld [vmem:[%s4414_s6 + $0x34] sm:$0xf] }
 0x485   :  { %2138 = vmatpush.bf16.msra.mxu3 %v4137_v37  ;;  %v4455_v37 = vld [vmem:[#allocation16_spill] sm:$0xff] }
 0x489   :  { %2139 = vmatpush.bf16.msra.mxu3 %v4122_v39  ;;  %v1996_v39 = vpop.f32.mrf.mxu2  ;;  %v4328_v61 = vpop.permute.xlu2 %1839 }
 0x48a   :  { %v1997_v28 = vadd.f32 %v1996_v39, %v4331_v41 }
 0x48d   :  { %2140 = vmatpush.bf16.msra.mxu3 %v4102_v58  ;;  %v2544_v58 = vld [vmem:[%s4414_s6 + $0x38] sm:$0xf0] }
 0x48e   :  { %v4264_v14 = vor.u32 %v2634_v2, %v2544_v58 }
 0x491   :  { %2141 = vmatpush.bf16.msra.mxu3 %v4454_v21  ;;  %v1998_v60 = vpop.f32.mrf.mxu2 }
 0x494   :  { %2054 = vmatmul.bf16.gmra.mxu3 %v4254_v11  ;;  %2103 = vmatmul.bf16.gmra.mxu2 %v4455_v37 }
 0x499   :  { %v2001_v27 = vpop.f32.mrf.mxu2 }
 0x49a   :  { %v2002_v33 = vadd.f32 %v2001_v27, %v4328_v61 }
 0x4a1   :  { %v2003_v17 = vpop.f32.mrf.mxu2 }
 0x4a2   :  { %v2004_v34 = vadd.f32 %v2003_v17, %v4345_v22 }
 0x4a4   :  { %2059 = vmatmul.bf16.gmra.mxu3 %v4264_v14  ;;  %2108 = vmatmul.bf16.gmra.mxu2 %v4456_v44 }
 0x4a9   :  { %v2006_v29 = vpop.f32.mrf.mxu2 }
 0x4aa   :  { %v2007_v37 = vadd.f32 %v2006_v29, %v4339_v36 }
 0x4b1   :  { %v2008_v35 = vpop.f32.mrf.mxu2 }
 0x4b2   :  { %v2009_v44 = vadd.f32 %v2008_v35, %v4324_v7 }
 0x4b4   :  { %2064 = vmatmul.bf16.gmra.mxu3 %v4274_v30  ;;  %2113 = vmatmul.bf16.gmra.mxu2 %v4457_v23 }
 0x4b9   :  { %v2011_v20 = vpop.f32.mrf.mxu2 }
 0x4c4   :  { %2069 = vmatmul.bf16.gmra.mxu3 %v4284_v15  ;;  %2118 = vmatmul.bf16.gmra.mxu2 %v4458_v63 }
 0x4d4   :  { %2074 = vmatmul.bf16.gmra.mxu3 %v4298_v47  ;;  %2123 = vmatmul.bf16.gmra.mxu2 %v4174_v18  ;;  %v2013_v18 = vpop.f32.mrf.mxu2 }
 0x4d5   :  { %v2014_v29 = vadd.f32 %v2013_v18, %v4322_v56 }
 0x4dc   :  { %v2016_v38 = vpop.f32.mrf.mxu2 }
 0x4e4   :  { %2079 = vmatmul.bf16.gmra.mxu3 %v4314_v52  ;;  %2128 = vmatmul.bf16.gmra.mxu2 %v4196_v19  ;;  %v4336_v19 = vpop.permute.xlu2 %1834  ;;  %v4348_v50 = vpop.f32.mrf.mxu2 }
 0x4e5   :  { %v1999_v24 = vadd.f32 %v1998_v60, %v4336_v19 }
 0x4ec   :  { %v2021_v39 = vpop.f32.mrf.mxu2 }
 0x4f4   :  { %2142 = vmatmul.bf16.vlgmr.msra.gmra.mxu3 %v4222_v53  ;;  %v2023_v23 = vpop.f32.mrf.mxu2 }
 0x4f7   :  { %v2045_v0 = vpop.f32.mrf.mxu3 }
 0x4f8   :  { %v2046_v42 = vadd.f32 %v2045_v0, %v1997_v28  ;;  %v2017_v28 = vadd.f32 %v2016_v38, %v4312_v1 }
 0x4fa   :  { %v2183_v8 = vmax.f32 %v2046_v42, 0.0 }
 0x4fc   :  { %v2026_v63 = vpop.f32.mrf.mxu2 }
 0x4ff   :  { %v2047_v12 = vpop.f32.mrf.mxu3 }
 0x500   :  { %v2048_v54 = vadd.f32 %v2047_v12, %v1999_v24 }
 0x502   :  { %v2185_v43 = vmax.f32 %v2048_v54, 0.0 }
 0x504   :  { %2147 = vmatmul.bf16.gmra.mxu3 %v4240_v48  ;;  %v4342_v53 = vpack.c.bf16 %v2185_v43, %v2183_v8  ;;  %v2028_v0 = vpop.f32.mrf.mxu2 }
 0x507   :  { %v2050_v40 = vpop.f32.mrf.mxu3 }
 0x508   :  { %v2051_v62 = vadd.f32 %v2050_v40, %v2002_v33 }
 0x50a   :  { %v2187_v5 = vmax.f32 %v2051_v62, 0.0 }
 0x50c   :  { %v2031_v12 = vpop.f32.mrf.mxu2 }
 0x50d   :  { %v2032_v62 = vadd.f32 %v2031_v12, %v4288_v4 }
 0x50f   :  { %v2052_v46 = vpop.f32.mrf.mxu3 }
 0x510   :  { %v2053_v26 = vadd.f32 %v2052_v46, %v2004_v34  ;;  %v2029_v34 = vadd.f32 %v2028_v0, %v4302_v25 }
 0x512   :  { %v2189_v21 = vmax.f32 %v2053_v26, 0.0 }
 0x514   :  { %2152 = vmatmul.bf16.gmra.mxu3 %v4254_v11  ;;  %v4351_v48 = vpack.c.bf16 %v2189_v21, %v2187_v5  ;;  %v2012_v11 = vadd.f32 %v2011_v20, %v4316_v16  ;;  %v2033_v54 = vpop.f32.mrf.mxu2  ;;  %v2027_v5 = vadd.f32 %v2026_v63, %v4290_v32 }
 0x515   :  { %v2034_v46 = vadd.f32 %v2033_v54, %v4320_v3 }
 0x517   :  { %v2055_v2 = vpop.f32.mrf.mxu3 }
 0x518   :  { %v2056_v58 = vadd.f32 %v2055_v2, %v2007_v37  ;;  %v2024_v37 = vadd.f32 %v2023_v23, %v4304_v13 }
 0x51a   :  { %v2191_v6 = vmax.f32 %v2056_v58, 0.0 }
 0x51c   :  { %v2094_v18 = vpop.f32.mrf.mxu2 }
 0x51f   :  { %v2057_v60 = vpop.f32.mrf.mxu3 }
 0x520   :  { %v2058_v10 = vadd.f32 %v2057_v60, %v2009_v44  ;;  %v2022_v60 = vadd.f32 %v2021_v39, %v4326_v45 }
 0x522   :  { %v2193_v27 = vmax.f32 %v2058_v10, 0.0 }
 0x524   :  { %2157 = vmatmul.bf16.gmra.mxu3 %v4264_v14  ;;  %v4356_v17 = vpack.c.bf16 %v2193_v27, %v2191_v6  ;;  %v2096_v33 = vpop.f32.mrf.mxu2 }
 0x527   :  { %v2060_v51 = vpop.f32.mrf.mxu3 }
 0x528   :  { %v2061_v9 = vadd.f32 %v2060_v51, %v2012_v11  ;;  %v2019_v11 = vadd.f32 %v4348_v50, %v4334_v55  ;;  %v2095_v51 = vadd.f32 %v2094_v18, %v4331_v41 }
 0x52a   :  { %v2195_v31 = vmax.f32 %v2061_v9, 0.0 }
 0x52c   :  { %v2099_v38 = vpop.f32.mrf.mxu2 }
 0x52f   :  { %v2062_v59 = vpop.f32.mrf.mxu3 }
 0x530   :  { %v2063_v57 = vadd.f32 %v2062_v59, %v2014_v29 }
 0x532   :  { %v2197_v35 = vmax.f32 %v2063_v57, 0.0 }
 0x534   :  { %2162 = vmatmul.bf16.gmra.mxu3 %v4274_v30  ;;  %v2221_v49 = vpack.c.bf16 %v2197_v35, %v2195_v31 }
 0x537   :  { %v2065_v14 = vpop.f32.mrf.mxu3 }
 0x538   :  { %v2066_v42 = vadd.f32 %v2065_v14, %v2017_v28  ;;  %v2097_v14 = vadd.f32 %v2096_v33, %v4336_v19 }
 0x53a   :  { %v2199_v12 = vmax.f32 %v2066_v42, 0.0 }
 0x53f   :  { %v2067_v24 = vpop.f32.mrf.mxu3 }
 0x540   :  { %v2068_v59 = vadd.f32 %v2067_v24, %v2019_v11  ;;  %v2100_v24 = vadd.f32 %v2099_v38, %v4328_v61  ;;  %v4385_v61 = vld [vmem:[%s4416_s8] sm:$0x1]  ;;  %s2758_s8 = smov [#allocation3]  }
 0x541   :  { %s2281_s22 = sshll.u32 %s2758_s8, 4  ;;  %s2282_s22 = int_to_ptr.vmem [resolvable:$true] %s2281_s22 }
 0x542   :  { %v2201_v28 = vmax.f32 %v2068_v59, 0.0 }
 0x544   :  { %2167 = vmatmul.bf16.gmra.mxu3 %v4284_v15  ;;  %v2223_v54 = vpack.c.bf16 %v2201_v28, %v2199_v12 }
 0x547   :  { %v2070_v20 = vpop.f32.mrf.mxu3 }
 0x548   :  { %v2071_v9 = vadd.f32 %v2070_v20, %v2022_v60 }
 0x54a   :  { %v2203_v35 = vmax.f32 %v2071_v9, 0.0 }
 0x54f   :  { %v2072_v8 = vpop.f32.mrf.mxu3 }
 0x550   :  { %v2073_v10 = vadd.f32 %v2072_v8, %v2024_v37 }
 0x552   :  { %v2205_v23 = vmax.f32 %v2073_v10, 0.0 }
 0x554   :  { %2172 = vmatmul.bf16.gmra.mxu3 %v4298_v47  ;;  %v2225_v39 = vpack.c.bf16 %v2205_v23, %v2203_v35 }
 0x557   :  { %v2075_v43 = vpop.f32.mrf.mxu3 }
 0x558   :  { %v2076_v2 = vadd.f32 %v2075_v43, %v2027_v5 }
 0x55a   :  { %v2207_v63 = vmax.f32 %v2076_v2, 0.0 }
 0x55f   :  { %v2077_v40 = vpop.f32.mrf.mxu3 }
 0x560   :  { %v2078_v21 = vadd.f32 %v2077_v40, %v2029_v34 }
 0x562   :  { %v2209_v6 = vmax.f32 %v2078_v21, 0.0 }
 0x564   :  { %2177 = vmatmul.bf16.gmra.mxu3 %v4314_v52  ;;  %v2101_v52 = vpop.f32.mrf.mxu2  ;;  %v2227_v57 = vpack.c.bf16 %v2209_v6, %v2207_v63 }
 0x565   :  { %v2102_v19 = vadd.f32 %v2101_v52, %v4345_v22 }
 0x567   :  { %v2080_v30 = vpop.f32.mrf.mxu3 }
 0x568   :  { %v2081_v15 = vadd.f32 %v2080_v30, %v2032_v62 }
 0x56a   :  { %v2211_v58 = vmax.f32 %v2081_v15, 0.0 }
 0x56c   :  { %v2104_v0 = vpop.f32.mrf.mxu2 }
 0x56d   :  { %v2105_v22 = vadd.f32 %v2104_v0, %v4339_v36 }
 0x56f   :  { %v2082_v26 = vpop.f32.mrf.mxu3 }
 0x570   :  { %v2083_v47 = vadd.f32 %v2082_v26, %v2034_v46 }
 0x572   :  { %v2213_v44 = vmax.f32 %v2083_v47, 0.0 }
 0x574   :  { %v2229_v27 = vpack.c.bf16 %v2213_v44, %v2211_v58  ;;  %v2106_v43 = vpop.f32.mrf.mxu2 }
 0x575   :  { %v2107_v15 = vadd.f32 %v2106_v43, %v4324_v7 }
 0x576   :  { %2239 = vmatpush.bf16.msra.mxu0 %v2229_v27 }
 0x577   :  { %v2143_v29 = vpop.f32.mrf.mxu3 }
 0x578   :  { %v2144_v31 = vadd.f32 %v2143_v29, %v2095_v51 }
 0x57a   :  { %2240 = vmatpush.bf16.msra.mxu0 %v2227_v57  ;;  %v2184_v20 = vmax.f32 %v2144_v31, 0.0 }
 0x57c   :  { %v2109_v62 = vpop.f32.mrf.mxu2 }
 0x57d   :  { %v2110_v2 = vadd.f32 %v2109_v62, %v4316_v16 }
 0x57e   :  { %2241 = vmatpush.bf16.msra.mxu0 %v2225_v39 }
 0x57f   :  { %v2145_v50 = vpop.f32.mrf.mxu3 }
 0x580   :  { %v2146_v41 = vadd.f32 %v2145_v50, %v2097_v14 }
 0x582   :  { %v2186_v8 = vmax.f32 %v2146_v41, 0.0  ;;  %2242 = vmatpush.bf16.msra.mxu0 %v2223_v54 }
 0x584   :  { %v4375_v18 = vpack.c.bf16 %v2186_v8, %v2184_v20  ;;  %v2111_v38 = vpop.f32.mrf.mxu2 }
 0x585   :  { %v2112_v52 = vadd.f32 %v2111_v38, %v4322_v56 }
 0x586   :  { %2243 = vmatpush.bf16.msra.mxu0 %v2221_v49 }
 0x587   :  { %v2148_v40 = vpop.f32.mrf.mxu3 }
 0x588   :  { %v2149_v30 = vadd.f32 %v2148_v40, %v2100_v24 }
 0x58a   :  { %2244 = vmatpush.bf16.msra.mxu0 %v4356_v17  ;;  %v2188_v34 = vmax.f32 %v2149_v30, 0.0 }
 0x58c   :  { %v2114_v37 = vpop.f32.mrf.mxu2 }
 0x58d   :  { %v2115_v7 = vadd.f32 %v2114_v37, %v4312_v1 }
 0x58e   :  { %2245 = vmatpush.bf16.msra.mxu0 %v4351_v48 }
 0x58f   :  { %v2150_v42 = vpop.f32.mrf.mxu3 }
 0x590   :  { %v2151_v33 = vadd.f32 %v2150_v42, %v2102_v19 }
 0x592   :  { %v2190_v46 = vmax.f32 %v2151_v33, 0.0  ;;  %2246 = vmatpush.bf16.msra.mxu0 %v4342_v53 }
 0x594   :  { %v4387_v49 = vpack.c.bf16 %v2190_v46, %v2188_v34  ;;  %v2116_v60 = vpop.f32.mrf.mxu2 }
 0x595   :  { %2247 = vmatmul.bf16.vlgmr.msra.gmra.mxu0 %v4385_v61 }
 0x597   :  { %v2153_v17 = vpop.f32.mrf.mxu3 }
 0x598   :  { %v2154_v48 = vadd.f32 %v2153_v17, %v2105_v22 }
 0x59a   :  { %v2192_v21 = vmax.f32 %v2154_v48, 0.0 }
 0x59c   :  { %v2119_v63 = vpop.f32.mrf.mxu2 }
 0x59d   :  { %v2120_v19 = vadd.f32 %v2119_v63, %v4326_v45 }
 0x59f   :  { %v2155_v26 = vpop.f32.mrf.mxu3 }
 0x5a0   :  { %v2156_v5 = vadd.f32 %v2155_v26, %v2107_v15  ;;  %v2236_v15 = vpop.permute.xlu0 %2235 }
 0x5a1   :  { %v2238_v26 = vperm.slane %v2236_v15, 0 }
 0x5a2   :  { %v2194_v53 = vmax.f32 %v2156_v5, 0.0  ;;  %v2271_v5 = vlaneseq }
 0x5a4   :  { %v2220_v47 = vpack.c.bf16 %v2194_v53, %v2192_v21  ;;  %v2121_v59 = vpop.f32.mrf.mxu2  ;;  %vm2273_vm3 = vcmp.lt.s32.totalorder %v2271_v5, 256 }
 0x5a5   :  { %v2122_v24 = vadd.f32 %v2121_v59, %v4304_v13 }
 0x5a7   :  { %v2158_v58 = vpop.f32.mrf.mxu3 }
 0x5a8   :  { %v2159_v44 = vadd.f32 %v2158_v58, %v2110_v2 }
 0x5aa   :  { %v2196_v6 = vmax.f32 %v2159_v44, 0.0 }
 0x5ac   :  { %v2124_v57 = vpop.f32.mrf.mxu2 }
 0x5ad   :  { %v2125_v41 = vadd.f32 %v2124_v57, %v4290_v32 }
 0x5af   :  { %v2160_v10 = vpop.f32.mrf.mxu3 }
 0x5b0   :  { %v2161_v36 = vadd.f32 %v2160_v10, %v2112_v52 }
 0x5b2   :  { %v2198_v27 = vmax.f32 %v2161_v36, 0.0 }
 0x5b4   :  { %v2222_v11 = vpack.c.bf16 %v2198_v27, %v2196_v6  ;;  %v2126_v31 = vpop.f32.mrf.mxu2 }
 0x5b5   :  { %v2127_v12 = vadd.f32 %v2126_v31, %v4302_v25  ;;  %v2117_v25 = vadd.f32 %v2116_v60, %v4334_v55 }
 0x5b7   :  { %v2163_v51 = vpop.f32.mrf.mxu3 }
 0x5b8   :  { %v2164_v9 = vadd.f32 %v2163_v51, %v2115_v7 }
 0x5ba   :  { %v2200_v48 = vmax.f32 %v2164_v9, 0.0 }
 0x5bc   :  { %v2129_v56 = vpop.f32.mrf.mxu2 }
 0x5bd   :  { %v2130_v14 = vadd.f32 %v2129_v56, %v4288_v4 }
 0x5bf   :  { %v2165_v29 = vpop.f32.mrf.mxu3 }
 0x5c0   :  { %v2166_v34 = vadd.f32 %v2165_v29, %v2117_v25 }
 0x5c2   :  { %v2202_v17 = vmax.f32 %v2166_v34, 0.0 }
 0x5c4   :  { %v2131_v0 = vpop.f32.mrf.mxu2  ;;  %v2224_v38 = vpack.c.bf16 %v2202_v17, %v2200_v48 }
 0x5c5   :  { %v2132_v1 = vadd.f32 %v2131_v0, %v4320_v3 }
 0x5c7   :  { %v2168_v23 = vpop.f32.mrf.mxu3 }
 0x5c8   :  { %v2169_v62 = vadd.f32 %v2168_v23, %v2120_v19 }
 0x5ca   :  { %v2204_v22 = vmax.f32 %v2169_v62, 0.0 }
 0x5cf   :  { %v2170_v16 = vpop.f32.mrf.mxu3 }
 0x5d0   :  { %v2171_v42 = vadd.f32 %v2170_v16, %v2122_v24 }
 0x5d2   :  { %v2206_v46 = vmax.f32 %v2171_v42, 0.0 }
 0x5d4   :  { %v2226_v13 = vpack.c.bf16 %v2206_v46, %v2204_v22 }
 0x5d7   :  { %v2173_v35 = vpop.f32.mrf.mxu3 }
 0x5d8   :  { %v2174_v43 = vadd.f32 %v2173_v35, %v2125_v41 }
 0x5da   :  { %v2208_v3 = vmax.f32 %v2174_v43, 0.0 }
 0x5df   :  { %v2175_v28 = vpop.f32.mrf.mxu3 }
 0x5e0   :  { %v2176_v20 = vadd.f32 %v2175_v28, %v2127_v12 }
 0x5e2   :  { %v2210_v33 = vmax.f32 %v2176_v20, 0.0 }
 0x5e4   :  { %v2228_v32 = vpack.c.bf16 %v2210_v33, %v2208_v3 }
 0x5e7   :  { %v2178_v39 = vpop.f32.mrf.mxu3 }
 0x5e8   :  { %v2179_v50 = vadd.f32 %v2178_v39, %v2130_v14 }
 0x5ea   :  { %v2212_v40 = vmax.f32 %v2179_v50, 0.0 }
 0x5ef   :  { %v2180_v54 = vpop.f32.mrf.mxu3 }
 0x5f0   :  { %v2181_v8 = vadd.f32 %v2180_v54, %v2132_v1 }
 0x5f2   :  { %v2214_v30 = vmax.f32 %v2181_v8, 0.0 }
 0x5f4   :  { %v2230_v4 = vpack.c.bf16 %v2214_v30, %v2212_v40 }
 0x5f6   :  { %2252 = vmatpush.bf16.msra.mxu1 %v2230_v4 }
 0x5fa   :  { %2253 = vmatpush.bf16.msra.mxu1 %v2228_v32 }
 0x5fe   :  { %2254 = vmatpush.bf16.msra.mxu1 %v2226_v13 }
 0x602   :  { %2255 = vmatpush.bf16.msra.mxu1 %v2224_v38 }
 0x606   :  { %2256 = vmatpush.bf16.msra.mxu1 %v2222_v11 }
 0x60a   :  { %2257 = vmatpush.bf16.msra.mxu1 %v2220_v47 }
 0x60e   :  { %2258 = vmatpush.bf16.msra.mxu1 %v4387_v49 }
 0x612   :  { %v2248_v45 = vpop.f32.mrf.mxu0  ;;  %2259 = vmatpush.bf16.msra.mxu1 %v4375_v18 }
 0x613   :  { %v2249_v47 = vadd.f32 %v2248_v45, %v2238_v26 }
 0x615   :  { %2260 = vmatmul.bf16.vlgmr.msra.gmra.mxu1 %v4385_v61 }
 0x61a   :  { %v2250_v55 = vpop.f32.mrf.mxu0 }
 0x692   :  { %v2261_v21 = vpop.f32.mrf.mxu1 }
 0x693   :  { %v2262_v53 = vadd.f32 %v2261_v21, %v2238_v26 }
 0x695   :  { %v2267_v49 = vrot.slane %v2262_v53, 7 }
 0x697   :  { %v2269_v18 = vsel %vm2268_vm2, %v2249_v47, %v2267_v49 }
 0x698   :  { %2275 = vst.msk [vmem:[#allocation3] sm:$0x3] %vm2273_vm3, %v2269_v18 }
 0x699   :  { %2286 = dma.vmem_to_hbm [thread:$0]  %s2282_s22, 32, %s2284_s24, [#allocation4]  }
 0x69a   :  { %v2263_v61 = vpop.f32.mrf.mxu1 }
 0x69b   :  { %2754 = dma.done.wait [#allocation4], 32  }
 0x69c   :  { %2755 = vsyncadd [#allocation4], 4294967264 }
 0x69d   :  { %2291 = vsyncpa [#allocation4], 1 }

</bundles_post_ra>
